<compile_context>
chip_gen: v7x
topology: tpu7x:2x2x1
jax: 0.10.0
libtpu: 0.0.40
codegen_flags: <defaults>
</compile_context>

<pallas_src>
import numpy as np
import jax
import jax.numpy as jnp
from jax.experimental import pallas as pl
from jax.experimental.pallas import tpu as pltpu

_ROW_BLOCK = 256  # row tile for the large-batch grid path


def _round_up(n, m):
    return ((n + m - 1) // m) * m


# ----------------------------- Pallas kernel ------------------------------

def _fused_mlp_kernel(x_ref, w1_ref, b1_ref, w2_ref, b2_ref, w3_ref, b3_ref, o_ref):
    # The linear front end (Haar x2 / crop / concat / pool / flatten) is pre-folded
    # into w1 on the host, so the forward is just Linear-ReLU-Linear-ReLU-Linear.
    xb = x_ref[...].astype(jnp.bfloat16)                 # bf16 MXU path, f32 accumulate
    h = jnp.dot(xb, w1_ref[...], preferred_element_type=jnp.float32) + b1_ref[...]
    h = jnp.maximum(h, 0.0)
    h = jnp.dot(h, w2_ref[...], preferred_element_type=jnp.float32) + b2_ref[...]
    h = jnp.maximum(h, 0.0)
    o_ref[...] = jnp.dot(h, w3_ref[...], preferred_element_type=jnp.float32) + b3_ref[...]


def _cost_estimate(n_rows, k):
    flops = 2 * n_rows * (k * 150 + 150 * 50 + 50 * 2)
    bytes_accessed = (n_rows * k * 4                     # x (f32)
                      + k * 150 * 2                      # folded w1 (bf16)
                      + (150 + 150 * 50 + 50 + 50 * 2 + 2) * 4   # small f32 params
                      + n_rows * 2 * 4)                  # logits
    return pl.CostEstimate(flops=flops, transcendentals=0,
                           bytes_accessed=int(bytes_accessed))


def _fused_call_single(x_flat, folded):
    """Small/medium batch: one full-array block, no padding, grid=(1,)."""
    N, K = x_flat.shape
    args = (x_flat,) + folded
    in_specs = [pl.BlockSpec(a.shape, lambda i, n=a.ndim: (0,) * n) for a in args]
    return pl.pallas_call(
        _fused_mlp_kernel,
        grid=(1,),
        in_specs=in_specs,
        out_specs=pl.BlockSpec((N, 2), lambda i: (0, 0)),
        out_shape=jax.ShapeDtypeStruct((N, 2), jnp.float32),
        compiler_params=pltpu.CompilerParams(dimension_semantics=("arbitrary",)),
        cost_estimate=_cost_estimate(N, K),
    )(*args)


def _fused_call_tiled(x_pad, folded):
    """Large batch: tile rows, weights stay resident (constant block index),
    batch axis marked parallel so v7x can split it across both TensorCores."""
    Np, K = x_pad.shape
    n_blocks = Np // _ROW_BLOCK
    args = (x_pad,) + folded
    in_specs = ([pl.BlockSpec((_ROW_BLOCK, K), lambda i: (i, 0))] +
                [pl.BlockSpec(a.shape, lambda i, n=a.ndim: (0,) * n) for a in folded])
    return pl.pallas_call(
        _fused_mlp_kernel,
        grid=(n_blocks,),
        in_specs=in_specs,
        out_specs=pl.BlockSpec((_ROW_BLOCK, 2), lambda i: (i, 0)),
        out_shape=jax.ShapeDtypeStruct((Np, 2), jnp.float32),
        compiler_params=pltpu.CompilerParams(dimension_semantics=("parallel",)),
        cost_estimate=_cost_estimate(Np, K),
    )(*args)


# --------------------- host-side linear front end (fold) -------------------

def _haar_np(img):
    """img: (B, H, W) -> (LL, stack([LL, LH, HL, HH]))  (orthonormal Haar)."""
    a = img[:, 0::2, 0::2]
    b = img[:, 0::2, 1::2]
    c = img[:, 1::2, 0::2]
    d = img[:, 1::2, 1::2]
    ll = 0.5 * (a + b + c + d)
    lh = 0.5 * (a - b + c - d)
    hl = 0.5 * (a + b - c - d)
    hh = 0.5 * (a - b - c + d)
    return ll, np.stack([ll, lh, hl, hh], axis=1)


def _adaptive_pool_matrix(in_size, out_size):
    # Exactly PyTorch's AdaptiveAvgPool2d bin boundaries.
    P = np.zeros((out_size, in_size), np.float64)
    for i in range(out_size):
        s = (i * in_size) // out_size
        e = -((-(i + 1) * in_size) // out_size)          # ceil((i+1)*in/out)
        P[i, s:e] = 1.0 / (e - s)
    return P


def _front_end_np(x):
    """x: (B, 1, H, W) -> (B, 8*6*6). Pure-numpy reference of the linear front end."""
    img = x[:, 0]
    ll1, x1 = _haar_np(img)                              # (B,4,H/2,W/2)
    ll2, x2 = _haar_np(ll1)                              # (B,4,H/4,W/4)
    Hc, Wc = x2.shape[2], x2.shape[3]
    # utils.tensor_cat(padding=False): crop larger bands to smaller, concat channels.
    xcat = np.concatenate([x1[:, :, :Hc, :Wc], x2], axis=1)   # (B,8,Hc,Wc)
    Ph = _adaptive_pool_matrix(Hc, 6)
    Pw = _adaptive_pool_matrix(Wc, 6)
    pooled = np.einsum('ph,bchw,qw->bcpq', Ph, xcat, Pw)      # (B,8,6,6)
    return pooled.reshape(x.shape[0], -1)


def _norm_linear(w, b, fan_in, fan_out):
    """Accept PyTorch-convention (out,in)/(out,) or (in,out)/(1,out) params."""
    w = np.asarray(w, np.float64)
    b = np.asarray(b, np.float64).reshape(1, fan_out)
    if w.shape == (fan_out, fan_in) and fan_in != fan_out:
        w = w.T
    assert w.shape == (fan_in, fan_out), f"bad weight shape {w.shape}"
    return w, b


def fold_params(H, W, params):
    """Fold the (H*W -> 288) linear front end into the first Linear layer and convert
    to kernel dtypes.  The dominant stream (folded w1) is stored in bf16, unpadded."""
    w1, b1 = _norm_linear(params[0], params[1], 8 * 6 * 6, 150)
    w2, b2 = _norm_linear(params[2], params[3], 150, 50)
    w3, b3 = _norm_linear(params[4], params[5], 50, 2)
    HW = H * W
    basis = np.eye(HW, dtype=np.float64).reshape(HW, 1, H, W)
    A = _front_end_np(basis)                             # (HW, 288) front-end operator
    w1f = A @ w1                                         # (HW, 150)
    return (jnp.asarray(w1f, jnp.bfloat16),
            jnp.asarray(b1, jnp.float32),
            jnp.asarray(w2, jnp.float32),
            jnp.asarray(b2, jnp.float32),
            jnp.asarray(w3, jnp.float32),
            jnp.asarray(b3, jnp.float32))


# --------------------------------- forward ---------------------------------

def incept_wave2_forward(x, folded):
    """x: (N, 1, H, W) f32 -> logits (N, 2) f32 (Dropout = identity / eval mode)."""
    N = x.shape[0]
    x_flat = x.reshape(N, -1).astype(jnp.float32)
    if N <= _ROW_BLOCK:
        return _fused_call_single(x_flat, folded)
    Np = _round_up(N, _ROW_BLOCK)
    x_pad = jnp.zeros((Np, x_flat.shape[1]), jnp.float32).at[:N].set(x_flat)
    return _fused_call_tiled(x_pad, folded)[:N]


def init_params(key):
    """PyTorch nn.Linear convention: weight (out, in), bias (out,)."""
    def linear(k, fan_in, fan_out):
        kw, kb = jax.random.split(k)
        bound = 1.0 / np.sqrt(fan_in)
        w = jax.random.uniform(kw, (fan_out, fan_in), jnp.float32, -bound, bound)
        b = jax.random.uniform(kb, (fan_out,), jnp.float32, -bound, bound)
        return w, b

    k1, k2, k3 = jax.random.split(key, 3)
    w1, b1 = linear(k1, 8 * 6 * 6, 150)
    w2, b2 = linear(k2, 150, 50)
    w3, b3 = linear(k3, 50, 2)
    return (w1, b1, w2, b2, w3, b3)


if __name__ == "__main__":
    key = jax.random.PRNGKey(0)
    kx, kp = jax.random.split(key)
    # (N=2, C=1, H=48, W=48): two Haar levels give 24x24 and 12x12 band maps,
    # pooled to 6x6 -> 8*6*6 = 288 classifier input.
    N, H, W = 2, 48, 48
    x = jax.random.normal(kx, (N, 1, H, W), jnp.float32)
    params = init_params(kp)
    folded = fold_params(H, W, params)                   # one-time host fold

    fwd = jax.jit(incept_wave2_forward)
    out = fwd(x, folded)
    jax.block_until_ready(out)
    assert out.shape == (N, 2) and out.dtype == jnp.float32

    # (a) Mechanics check: numpy forward with the exact (bf16-quantized) weights the
    #     kernel consumes — verifies the fused matmul/bias/ReLU pipeline.
    x_flat64 = np.asarray(x, np.float64).reshape(N, -1)
    xq = np.asarray(jnp.asarray(x_flat64, jnp.float32)
                    .astype(jnp.bfloat16).astype(jnp.float32), np.float64)
    w1q, b1q, w2q, b2q, w3q, b3q = [
        np.asarray(jnp.asarray(p, jnp.float32), np.float64) for p in folded]
    h = np.maximum(xq @ w1q + b1q, 0.0)
    h = np.maximum(h @ w2q + b2q, 0.0)
    ref_mech = h @ w3q + b3q
    np.testing.assert_allclose(np.asarray(out, np.float64), ref_mech,
                               rtol=2e-3, atol=2e-3)

    # (b) Semantic check vs the full-precision reference of the original forward
    #     (bf16 weight storage -> loosened tolerance, per review).
    feat = _front_end_np(np.asarray(x, np.float64))      # (N, 288)
    w1, b1 = _norm_linear(params[0], params[1], 288, 150)
    w2, b2 = _norm_linear(params[2], params[3], 150, 50)
    w3, b3 = _norm_linear(params[4], params[5], 50, 2)
    h = np.maximum(feat @ w1 + b1, 0.0)
    h = np.maximum(h @ w2 + b2, 0.0)
    ref_full = h @ w3 + b3
    np.testing.assert_allclose(np.asarray(out, np.float64), ref_full,
                               rtol=2e-2, atol=2e-2)

    print("KERNEL_OK")
</pallas_src>

<mosaic_0001>
module attributes {stable_mosaic.version = 11 : i64} {
  func.func @_fused_mlp_kernel(%arg0: i32, %arg1: memref<2x2304xf32, #tpu.memory_space<vmem>>, %arg2: memref<2304x150xbf16, #tpu.memory_space<vmem>>, %arg3: memref<1x150xf32, #tpu.memory_space<vmem>>, %arg4: memref<150x50xf32, #tpu.memory_space<vmem>>, %arg5: memref<1x50xf32, #tpu.memory_space<vmem>>, %arg6: memref<50x2xf32, #tpu.memory_space<vmem>>, %arg7: memref<1x2xf32, #tpu.memory_space<vmem>>, %arg8: memref<2x2xf32, #tpu.memory_space<vmem>>) attributes {dimension_semantics = [#tpu.dimension_semantics<arbitrary>], iteration_bounds = array<i64: 1>, scalar_prefetch = 0 : i64, scratch_operands = 0 : i64, tpu.core_type = #tpu.core_type<tc>, window_params = [{pipeline_mode = #tpu.pipeline_mode<synchronous>, transform_indices = @transform_0, window_bounds = array<i64: 2, 2304>}, {pipeline_mode = #tpu.pipeline_mode<synchronous>, transform_indices = @transform_1, window_bounds = array<i64: 2304, 150>}, {pipeline_mode = #tpu.pipeline_mode<synchronous>, transform_indices = @transform_2, window_bounds = array<i64: 1, 150>}, {pipeline_mode = #tpu.pipeline_mode<synchronous>, transform_indices = @transform_3, window_bounds = array<i64: 150, 50>}, {pipeline_mode = #tpu.pipeline_mode<synchronous>, transform_indices = @transform_4, window_bounds = array<i64: 1, 50>}, {pipeline_mode = #tpu.pipeline_mode<synchronous>, transform_indices = @transform_5, window_bounds = array<i64: 50, 2>}, {pipeline_mode = #tpu.pipeline_mode<synchronous>, transform_indices = @transform_6, window_bounds = array<i64: 1, 2>}, {pipeline_mode = #tpu.pipeline_mode<synchronous>, transform_indices = @transform_7, window_bounds = array<i64: 2, 2>}]} {
    %c0 = arith.constant 0 : index
    %c0_0 = arith.constant 0 : index
    %0 = vector.load %arg1[%c0, %c0_0] : memref<2x2304xf32, #tpu.memory_space<vmem>>, vector<2x2304xf32>
    %1 = arith.truncf %0 : vector<2x2304xf32> to vector<2x2304xbf16>
    %c0_1 = arith.constant 0 : index
    %c0_2 = arith.constant 0 : index
    %2 = vector.load %arg2[%c0_1, %c0_2] : memref<2304x150xbf16, #tpu.memory_space<vmem>>, vector<2304x150xbf16>
    %cst = arith.constant dense<0.000000e+00> : vector<2x150xf32>
    %3 = tpu.matmul %1, %2, %cst {dimension_numbers = #tpu.dot_dimension_numbers<[1], [0], [0], [1], [0, 0, 1, 1], [], []>} : vector<2x2304xbf16>, vector<2304x150xbf16>, vector<2x150xf32> -> vector<2x150xf32>
    %c0_3 = arith.constant 0 : index
    %c0_4 = arith.constant 0 : index
    %4 = vector.load %arg3[%c0_3, %c0_4] : memref<1x150xf32, #tpu.memory_space<vmem>>, vector<1x150xf32>
    %5 = vector.broadcast %4 : vector<1x150xf32> to vector<2x150xf32>
    %6 = arith.addf %3, %5 : vector<2x150xf32>
    %cst_5 = arith.constant 0.000000e+00 : f32
    %7 = vector.broadcast %cst_5 : f32 to vector<2x150xf32>
    %8 = arith.maximumf %6, %7 : vector<2x150xf32>
    %c0_6 = arith.constant 0 : index
    %c0_7 = arith.constant 0 : index
    %9 = vector.load %arg4[%c0_6, %c0_7] : memref<150x50xf32, #tpu.memory_space<vmem>>, vector<150x50xf32>
    %cst_8 = arith.constant dense<0.000000e+00> : vector<2x50xf32>
    %10 = tpu.matmul %8, %9, %cst_8 {dimension_numbers = #tpu.dot_dimension_numbers<[1], [0], [0], [1], [0, 0, 1, 1], [], []>} : vector<2x150xf32>, vector<150x50xf32>, vector<2x50xf32> -> vector<2x50xf32>
    %c0_9 = arith.constant 0 : index
    %c0_10 = arith.constant 0 : index
    %11 = vector.load %arg5[%c0_9, %c0_10] : memref<1x50xf32, #tpu.memory_space<vmem>>, vector<1x50xf32>
    %12 = vector.broadcast %11 : vector<1x50xf32> to vector<2x50xf32>
    %13 = arith.addf %10, %12 : vector<2x50xf32>
    %cst_11 = arith.constant 0.000000e+00 : f32
    %14 = vector.broadcast %cst_11 : f32 to vector<2x50xf32>
    %15 = arith.maximumf %13, %14 : vector<2x50xf32>
    %c0_12 = arith.constant 0 : index
    %c0_13 = arith.constant 0 : index
    %16 = vector.load %arg6[%c0_12, %c0_13] : memref<50x2xf32, #tpu.memory_space<vmem>>, vector<50x2xf32>
    %cst_14 = arith.constant dense<0.000000e+00> : vector<2x2xf32>
    %17 = tpu.matmul %15, %16, %cst_14 {dimension_numbers = #tpu.dot_dimension_numbers<[1], [0], [0], [1], [0, 0, 1, 1], [], []>} : vector<2x50xf32>, vector<50x2xf32>, vector<2x2xf32> -> vector<2x2xf32>
    %c0_15 = arith.constant 0 : index
    %c0_16 = arith.constant 0 : index
    %18 = vector.load %arg7[%c0_15, %c0_16] : memref<1x2xf32, #tpu.memory_space<vmem>>, vector<1x2xf32>
    %19 = vector.broadcast %18 : vector<1x2xf32> to vector<2x2xf32>
    %20 = arith.addf %17, %19 : vector<2x2xf32>
    %c0_17 = arith.constant 0 : index
    %c0_18 = arith.constant 0 : index
    %21 = vector.load %arg8[%c0_17, %c0_18] : memref<2x2xf32, #tpu.memory_space<vmem>>, vector<2x2xf32>
    tpu.vector_store %arg8[%c0_17, %c0_18], %20 {strides = array<i32>} : memref<2x2xf32, #tpu.memory_space<vmem>>, vector<2x2xf32>,
    return
  }
  func.func @transform_0(%arg0: i32) -> (i32, i32) {
    %c0_i32 = arith.constant 0 : i32
    %c0_i32_0 = arith.constant 0 : i32
    %c0_i32_1 = arith.constant 0 : i32
    return %c0_i32, %c0_i32_0 : i32, i32
  }
  func.func @transform_1(%arg0: i32) -> (i32, i32) {
    %c0_i32 = arith.constant 0 : i32
    %c0_i32_0 = arith.constant 0 : i32
    %c0_i32_1 = arith.constant 0 : i32
    return %c0_i32, %c0_i32_0 : i32, i32
  }
  func.func @transform_2(%arg0: i32) -> (i32, i32) {
    %c0_i32 = arith.constant 0 : i32
    %c0_i32_0 = arith.constant 0 : i32
    %c0_i32_1 = arith.constant 0 : i32
    return %c0_i32, %c0_i32_0 : i32, i32
  }
  func.func @transform_3(%arg0: i32) -> (i32, i32) {
    %c0_i32 = arith.constant 0 : i32
    %c0_i32_0 = arith.constant 0 : i32
    %c0_i32_1 = arith.constant 0 : i32
    return %c0_i32, %c0_i32_0 : i32, i32
  }
  func.func @transform_4(%arg0: i32) -> (i32, i32) {
    %c0_i32 = arith.constant 0 : i32
    %c0_i32_0 = arith.constant 0 : i32
    %c0_i32_1 = arith.constant 0 : i32
    return %c0_i32, %c0_i32_0 : i32, i32
  }
  func.func @transform_5(%arg0: i32) -> (i32, i32) {
    %c0_i32 = arith.constant 0 : i32
    %c0_i32_0 = arith.constant 0 : i32
    %c0_i32_1 = arith.constant 0 : i32
    return %c0_i32, %c0_i32_0 : i32, i32
  }
  func.func @transform_6(%arg0: i32) -> (i32, i32) {
    %c0_i32 = arith.constant 0 : i32
    %c0_i32_0 = arith.constant 0 : i32
    %c0_i32_1 = arith.constant 0 : i32
    return %c0_i32, %c0_i32_0 : i32, i32
  }
  func.func @transform_7(%arg0: i32) -> (i32, i32) {
    %c0_i32 = arith.constant 0 : i32
    %c0_i32_0 = arith.constant 0 : i32
    %c0_i32_1 = arith.constant 0 : i32
    return %c0_i32, %c0_i32_0 : i32, i32
  }
}

</mosaic_0001>

<bundles_post_ra>
// kernel: incept_wave2_forward.1
= control target key start
LH: loop header
LB: loop body
LE: loop exit
PB: predicated region body
PF: predicated region fallthrough
CT: control target
= control target key end

     0   :  { %v3326_v36 = vmov 1983009808   ;;  %v41_v38 = vlaneseq  ;;  %s4434_s0 = inlined_call_operand.vmem [shape: f32[2,2304], index: 0, kind: input, shape index: {}]   ;;  %s4435_s1 = inlined_call_operand.vmem [shape: bf16[2304,150], index: 1, kind: input, shape index: {}]   ;;  %s4436_s2 = inlined_call_operand.vmem [shape: f32[1,150], index: 2, kind: input, shape index: {}]   ;;  %s4437_s3 = inlined_call_operand.vmem [shape: f32[150,50], index: 3, kind: input, shape index: {}]   ;;  %s4438_s4 = inlined_call_operand.vmem [shape: f32[1,50], index: 4, kind: input, shape index: {}]   ;;  %s4439_s5 = inlined_call_operand.vmem [shape: f32[50,2], index: 5, kind: input, shape index: {}]   ;;  %s4440_s6 = inlined_call_operand.vmem [shape: f32[1,2], index: 6, kind: input, shape index: {}]   ;;  %s4441_s7 = inlined_call_operand.hbm [shape: f32[2,2], index: 7, kind: output, shape index: {}]  }
   0x1   :  { %v2866_v0 = vld [vmem:[%s4435_s1 + $0x4] ss:$8 sps:$4 sm:$0xff]   ;;  %v2870_v2 = vld [vmem:[%s4435_s1] ss:$8 sps:$4 sm:$0xff]   ;;  %v2872_v4 = vld [vmem:[%s4435_s1 + $0x14] ss:$8 sps:$4 sm:$0xff]   ;;  %v39_v37 = vunpack.c.l.s4 %v3326_v36 }
   0x2   :  { %v2868_v1 = vld [vmem:[%s4435_s1 + $0x404] ss:$8 sps:$4 sm:$0xff]   ;;  %1889 = vmatprep.subr.bf16.mxu1 %v2866_v0  ;;  %v2871_v3 = vld [vmem:[%s4435_s1 + $0x400] ss:$8 sps:$4 sm:$0xff]   ;;  %v2874_v5 = vld [vmem:[%s4435_s1 + $0x414] ss:$8 sps:$4 sm:$0xff]  }
   0x3   :  { %2053 = vmatprep.subr.bf16.mxu0 %v2868_v1  ;;  %1890 = vmatpush1.bf16.msra.mxu1 %v2870_v2  ;;  %v2876_v6 = vld [vmem:[%s4435_s1 + $0x10] ss:$8 sps:$4 sm:$0xff]   ;;  %v2878_v8 = vld [vmem:[%s4435_s1 + $0x24] ss:$8 sps:$4 sm:$0xff]   ;;  %v2882_v10 = vld [vmem:[%s4435_s1 + $0x20] ss:$8 sps:$4 sm:$0xff]   ;;  %v40_v42 = vunpack.c.0.s8 %v39_v37 }
   0x4   :  { %2054 = vmatpush1.bf16.msra.mxu0 %v2871_v3  ;;  %1891 = vmatprep.subr.bf16.mxu1 %v2872_v4  ;;  %v2877_v7 = vld [vmem:[%s4435_s1 + $0x410] ss:$8 sps:$4 sm:$0xff]   ;;  %v2880_v9 = vld [vmem:[%s4435_s1 + $0x424] ss:$8 sps:$4 sm:$0xff]   ;;  %v2883_v11 = vld [vmem:[%s4435_s1 + $0x420] ss:$8 sps:$4 sm:$0xff]  }
   0x5   :  { %2055 = vmatprep.subr.bf16.mxu0 %v2874_v5  ;;  %v2884_v12 = vld [vmem:[%s4435_s1 + $0x34] ss:$8 sps:$4 sm:$0xff]   ;;  %v2888_v14 = vld [vmem:[%s4435_s1 + $0x30] ss:$8 sps:$4 sm:$0xff]   ;;  %v2890_v16 = vld [vmem:[%s4435_s1 + $0x44] ss:$8 sps:$4 sm:$0xff]  }
   0x6   :  { %v2886_v13 = vld [vmem:[%s4435_s1 + $0x434] ss:$8 sps:$4 sm:$0xff]   ;;  %v2889_v15 = vld [vmem:[%s4435_s1 + $0x430] ss:$8 sps:$4 sm:$0xff]   ;;  %v2892_v17 = vld [vmem:[%s4435_s1 + $0x444] ss:$8 sps:$4 sm:$0xff]  }
   0x7   :  { %1892 = vmatpush1.bf16.msra.mxu1 %v2876_v6  ;;  %v2894_v18 = vld [vmem:[%s4435_s1 + $0x40] ss:$8 sps:$4 sm:$0xff]   ;;  %v2896_v20 = vld [vmem:[%s4435_s1 + $0x54] ss:$8 sps:$4 sm:$0xff]   ;;  %v2900_v22 = vld [vmem:[%s4435_s1 + $0x50] ss:$8 sps:$4 sm:$0xff]  }
   0x8   :  { %2056 = vmatpush1.bf16.msra.mxu0 %v2877_v7  ;;  %1893 = vmatprep.subr.bf16.mxu1 %v2878_v8  ;;  %v2895_v19 = vld [vmem:[%s4435_s1 + $0x440] ss:$8 sps:$4 sm:$0xff]   ;;  %v2898_v21 = vld [vmem:[%s4435_s1 + $0x454] ss:$8 sps:$4 sm:$0xff]   ;;  %v2901_v23 = vld [vmem:[%s4435_s1 + $0x450] ss:$8 sps:$4 sm:$0xff]  }
   0x9   :  { %2057 = vmatprep.subr.bf16.mxu0 %v2880_v9  ;;  %v2902_v24 = vld [vmem:[%s4435_s1 + $0x64] ss:$8 sps:$4 sm:$0xff]   ;;  %v2906_v26 = vld [vmem:[%s4435_s1 + $0x60] ss:$8 sps:$4 sm:$0xff]   ;;  %v2908_v28 = vld [vmem:[%s4435_s1 + $0x74] ss:$8 sps:$4 sm:$0xff]  }
   0xa   :  { %v2904_v25 = vld [vmem:[%s4435_s1 + $0x464] ss:$8 sps:$4 sm:$0xff]   ;;  %v2907_v27 = vld [vmem:[%s4435_s1 + $0x460] ss:$8 sps:$4 sm:$0xff]   ;;  %v2910_v29 = vld [vmem:[%s4435_s1 + $0x474] ss:$8 sps:$4 sm:$0xff]  }
   0xb   :  { %1894 = vmatpush1.bf16.msra.mxu1 %v2882_v10  ;;  %v2912_v30 = vld [vmem:[%s4435_s1 + $0x70] ss:$8 sps:$4 sm:$0xff]   ;;  %v2914_v32 = vld [vmem:[%s4435_s1 + $0x84] ss:$8 sps:$4 sm:$0xff]   ;;  %v2918_v34 = vld [vmem:[%s4435_s1 + $0x80] ss:$8 sps:$4 sm:$0xff]  }
   0xc   :  { %2058 = vmatpush1.bf16.msra.mxu0 %v2883_v11  ;;  %1895 = vmatprep.subr.bf16.mxu1 %v2884_v12  ;;  %v2913_v31 = vld [vmem:[%s4435_s1 + $0x470] ss:$8 sps:$4 sm:$0xff]   ;;  %v2916_v33 = vld [vmem:[%s4435_s1 + $0x484] ss:$8 sps:$4 sm:$0xff]   ;;  %v2919_v35 = vld [vmem:[%s4435_s1 + $0x480] ss:$8 sps:$4 sm:$0xff]  }
   0xd   :  { %2059 = vmatprep.subr.bf16.mxu0 %v2886_v13  ;;  %v2920_v39 = vld [vmem:[%s4435_s1 + $0x94] ss:$8 sps:$4 sm:$0xff]   ;;  %v2924_v41 = vld [vmem:[%s4435_s1 + $0x90] ss:$8 sps:$4 sm:$0xff]   ;;  %v3488_v43 = vshrl.u32 %v41_v38, 7  ;;  %v27_v52 = vld [vmem:[%s4434_s0] sm:$0xff] }
   0xe   :  { %v2922_v40 = vld [vmem:[%s4435_s1 + $0x494] ss:$8 sps:$4 sm:$0xff]   ;;  %v2925_v44 = vld [vmem:[%s4435_s1 + $0x490] ss:$8 sps:$4 sm:$0xff]   ;;  %v2926_v45 = vld [vmem:[%s4435_s1 + $0xa4] ss:$8 sps:$4 sm:$0xff]   ;;  %v37_v8 = vcombine.high %v27_v52, %v27_v52 }
   0xf   :  { %1896 = vmatpush1.bf16.msra.mxu1 %v2888_v14  ;;  %v2928_v46 = vld [vmem:[%s4435_s1 + $0x4a4] ss:$8 sps:$4 sm:$0xff]   ;;  %v2930_v47 = vld [vmem:[%s4435_s1 + $0xa0] ss:$8 sps:$4 sm:$0xff]   ;;  %v3506_v49 = vsub.s32 %v40_v42, %v3488_v43  ;;  %v2932_v50 = vld [vmem:[%s4435_s1 + $0xb4] ss:$8 sps:$4 sm:$0xff]  }
  0x10   :  { %2060 = vmatpush1.bf16.msra.mxu0 %v2889_v15  ;;  %1897 = vmatprep.subr.bf16.mxu1 %v2890_v16  ;;  %v2931_v48 = vld [vmem:[%s4435_s1 + $0x4a0] ss:$8 sps:$4 sm:$0xff]   ;;  %v2934_v51 = vld [vmem:[%s4435_s1 + $0x4b4] ss:$8 sps:$4 sm:$0xff]   ;;  %v2936_v53 = vld [vmem:[%s4435_s1 + $0xb0] ss:$8 sps:$4 sm:$0xff]  }
  0x11   :  { %2061 = vmatprep.subr.bf16.mxu0 %v2892_v17  ;;  %v3521_v54 = vrot.slane %v27_v52, %v3506_v49  ;;  %v2937_v55 = vld [vmem:[%s4435_s1 + $0x4b0] ss:$8 sps:$4 sm:$0xff]   ;;  %v2938_v57 = vld [vmem:[%s4435_s1 + $0xc4] ss:$8 sps:$4 sm:$0xff]   ;;  %v2942_v63 = vld [vmem:[%s4435_s1 + $0xc0] ss:$8 sps:$4 sm:$0xff]   ;;  %v3575_v14 = vrot.slane %v37_v8, %v3506_v49 }
  0x12   :  { %v29_v56 = vld [vmem:[%s4434_s0 + $0x10] sm:$0xff]  ;;  %v2940_v58 = vld [vmem:[%s4435_s1 + $0x4c4] ss:$8 sps:$4 sm:$0xff]   ;;  %v2943_v0 = vld [vmem:[%s4435_s1 + $0x4c0] ss:$8 sps:$4 sm:$0xff]  }
  0x13   :  { %1898 = vmatpush1.bf16.msra.mxu1 %v2894_v18  ;;  %v52_v59 = vcombine.high %v3521_v54, %v3521_v54  ;;  %v78_v60 = vrot.slane %v29_v56, %v3506_v49  ;;  %v2944_v1 = vld [vmem:[%s4435_s1 + $0xd4] ss:$8 sps:$4 sm:$0xff]   ;;  %v2948_v4 = vld [vmem:[%s4435_s1 + $0xd0] ss:$8 sps:$4 sm:$0xff]   ;;  %v2950_v6 = vld [vmem:[%s4435_s1 + $0xe4] ss:$8 sps:$4 sm:$0xff]   ;;  %v71_v9 = vcombine.high %v29_v56, %v29_v56 }
  0x14   :  { %2062 = vmatpush1.bf16.msra.mxu0 %v2895_v19  ;;  %1899 = vmatprep.subr.bf16.mxu1 %v2896_v20  ;;  %v2946_v2 = vld [vmem:[%s4435_s1 + $0x4d4] ss:$8 sps:$4 sm:$0xff]   ;;  %v2949_v5 = vld [vmem:[%s4435_s1 + $0x4d0] ss:$8 sps:$4 sm:$0xff]   ;;  %v2952_v7 = vld [vmem:[%s4435_s1 + $0x4e4] ss:$8 sps:$4 sm:$0xff]   ;;  %v53_v20 = vcombine.high %v3575_v14, %v3575_v14 }
  0x15   :  { %2063 = vmatprep.subr.bf16.mxu0 %v2898_v21  ;;  %v132_v61 = vpack.c.bf16 %v52_v59, %v52_v59  ;;  %v86_v62 = vcombine.high %v78_v60, %v78_v60  ;;  %v2954_v10 = vld [vmem:[%s4435_s1 + $0xe0] ss:$8 sps:$4 sm:$0xff]   ;;  %v2956_v12 = vld [vmem:[%s4435_s1 + $0xf4] ss:$8 sps:$4 sm:$0xff]   ;;  %v3578_v15 = vrot.slane %v71_v9, %v3506_v49  ;;  %v2960_v16 = vld [vmem:[%s4435_s1 + $0xf0] ss:$8 sps:$4 sm:$0xff]  }
  0x16   :  { %v2955_v11 = vld [vmem:[%s4435_s1 + $0x4e0] ss:$8 sps:$4 sm:$0xff]   ;;  %v2958_v13 = vld [vmem:[%s4435_s1 + $0x4f4] ss:$8 sps:$4 sm:$0xff]   ;;  %v2961_v17 = vld [vmem:[%s4435_s1 + $0x4f0] ss:$8 sps:$4 sm:$0xff]  }
  0x17   :  { %1900 = vmatpush1.bf16.msra.mxu1 %v2900_v22  ;;  %v140_v3 = vpack.c.bf16 %v86_v62, %v86_v62  ;;  %1921 = vmatprep.mubr.bf16.mxu1 %v132_v61  ;;  %v2965_v18 = vld [vmem:[%s4435_s1 + $0x104] ss:$8 sps:$4 sm:$0xff]   ;;  %v87_v21 = vcombine.high %v3578_v15, %v3578_v15  ;;  %v131_v22 = vpack.c.bf16 %v3521_v54, %v3521_v54  ;;  %v2984_v36 = vld [vmem:[%s4435_s1 + $0x134] ss:$8 sps:$4 sm:$0xff]   ;;  %v2982_v38 = vld [vmem:[%s4435_s1 + $0x130] ss:$8 sps:$4 sm:$0xff]  }
  0x18   :  { %2064 = vmatpush1.bf16.msra.mxu0 %v2901_v23  ;;  %1901 = vmatprep.subr.bf16.mxu1 %v2902_v24  ;;  %v2969_v19 = vld [vmem:[%s4435_s1 + $0x504] ss:$8 sps:$4 sm:$0xff]   ;;  %v139_v23 = vpack.c.bf16 %v78_v60, %v78_v60  ;;  %v2963_v24 = vld [vmem:[%s4435_s1 + $0x100] ss:$8 sps:$4 sm:$0xff]   ;;  %v2987_v37 = vld [vmem:[%s4435_s1 + $0x534] ss:$8 sps:$4 sm:$0xff]  }
  0x19   :  { %2065 = vmatprep.subr.bf16.mxu0 %v2904_v25  ;;  %2085 = vmatprep.mubr.bf16.mxu0 %v140_v3  ;;  %v2967_v25 = vld [vmem:[%s4435_s1 + $0x500] ss:$8 sps:$4 sm:$0xff]   ;;  %v3008_v54 = vld [vmem:[%s4435_s1 + $0x174] ss:$8 sps:$4 sm:$0xff]   ;;  %v3006_v56 = vld [vmem:[%s4435_s1 + $0x170] ss:$8 sps:$4 sm:$0xff]  }
  0x1a   :  { %v2988_v42 = vld [vmem:[%s4435_s1 + $0x140] ss:$8 sps:$4 sm:$0xff]   ;;  %v3017_v59 = vld [vmem:[%s4435_s1 + $0x584] ss:$8 sps:$4 sm:$0xff]   ;;  %v3020_v62 = vld [vmem:[%s4435_s1 + $0x194] ss:$8 sps:$4 sm:$0xff]  }
  0x1b   :  { %1902 = vmatpush1.bf16.msra.mxu1 %v2906_v26  ;;  %v2972_v26 = vld [vmem:[%s4435_s1 + $0x114] ss:$8 sps:$4 sm:$0xff]   ;;  %v3000_v52 = vld [vmem:[%s4435_s1 + $0x160] ss:$8 sps:$4 sm:$0xff]   ;;  %v3029_v3 = vld [vmem:[%s4435_s1 + $0x5a4] ss:$8 sps:$4 sm:$0xff]  }
  0x1c   :  { %2066 = vmatpush1.bf16.msra.mxu0 %v2907_v27  ;;  %1903 = vmatprep.subr.bf16.mxu1 %v2908_v28  ;;  %v2975_v27 = vld [vmem:[%s4435_s1 + $0x514] ss:$8 sps:$4 sm:$0xff]   ;;  %v134_v28 = vpack.c.bf16 %v53_v20, %v53_v20  ;;  %v3012_v60 = vld [vmem:[%s4435_s1 + $0x180] ss:$8 sps:$4 sm:$0xff]   ;;  %v3030_v8 = vld [vmem:[%s4435_s1 + $0x1b0] ss:$8 sps:$4 sm:$0xff]  }
  0x1d   :  { %2067 = vmatprep.subr.bf16.mxu0 %v2910_v29  ;;  %v142_v29 = vpack.c.bf16 %v87_v21, %v87_v21  ;;  %v3015_v61 = vld [vmem:[%s4435_s1 + $0x580] ss:$8 sps:$4 sm:$0xff]   ;;  %v3033_v9 = vld [vmem:[%s4435_s1 + $0x5b0] ss:$8 sps:$4 sm:$0xff]   ;;  %v3050_v20 = vld [vmem:[%s4435_s1 + $0x1e4] ss:$8 sps:$4 sm:$0xff]  }
  0x1e   :  { %v3053_v21 = vld [vmem:[%s4435_s1 + $0x5e4] ss:$8 sps:$4 sm:$0xff]  }
  0x1f   :  { %1904 = vmatpush1.bf16.msra.mxu1 %v2912_v30  ;;  %v2970_v30 = vld [vmem:[%s4435_s1 + $0x110] ss:$8 sps:$4 sm:$0xff]  }
  0x20   :  { %2068 = vmatpush1.bf16.msra.mxu0 %v2913_v31  ;;  %1905 = vmatprep.subr.bf16.mxu1 %v2914_v32  ;;  %v2973_v31 = vld [vmem:[%s4435_s1 + $0x510] ss:$8 sps:$4 sm:$0xff]   ;;  %v2978_v32 = vld [vmem:[%s4435_s1 + $0x124] ss:$8 sps:$4 sm:$0xff]  }
  0x21   :  { %2069 = vmatprep.subr.bf16.mxu0 %v2916_v33  ;;  %v2981_v33 = vld [vmem:[%s4435_s1 + $0x524] ss:$8 sps:$4 sm:$0xff]  }
  0x23   :  { %1906 = vmatpush1.bf16.msra.mxu1 %v2918_v34  ;;  %v2976_v34 = vld [vmem:[%s4435_s1 + $0x120] ss:$8 sps:$4 sm:$0xff]  }
  0x24   :  { %2070 = vmatpush1.bf16.msra.mxu0 %v2919_v35  ;;  %1907 = vmatprep.subr.bf16.mxu1 %v2920_v39  ;;  %v2979_v35 = vld [vmem:[%s4435_s1 + $0x520] ss:$8 sps:$4 sm:$0xff]   ;;  %v2985_v39 = vld [vmem:[%s4435_s1 + $0x530] ss:$8 sps:$4 sm:$0xff]  }
  0x25   :  { %2071 = vmatprep.subr.bf16.mxu0 %v2922_v40  ;;  %v2990_v40 = vld [vmem:[%s4435_s1 + $0x144] ss:$8 sps:$4 sm:$0xff]  }
  0x27   :  { %1908 = vmatpush1.bf16.msra.mxu1 %v2924_v41  ;;  %v2993_v41 = vld [vmem:[%s4435_s1 + $0x544] ss:$8 sps:$4 sm:$0xff]  }
  0x28   :  { %2072 = vmatpush1.bf16.msra.mxu0 %v2925_v44  ;;  %1909 = vmatprep.subr.bf16.mxu1 %v2926_v45  ;;  %v2991_v44 = vld [vmem:[%s4435_s1 + $0x540] ss:$8 sps:$4 sm:$0xff]   ;;  %v2996_v45 = vld [vmem:[%s4435_s1 + $0x154] ss:$8 sps:$4 sm:$0xff]  }
  0x29   :  { %2073 = vmatprep.subr.bf16.mxu0 %v2928_v46  ;;  %v2999_v46 = vld [vmem:[%s4435_s1 + $0x554] ss:$8 sps:$4 sm:$0xff]  }
  0x2b   :  { %1910 = vmatpush1.bf16.msra.mxu1 %v2930_v47  ;;  %v2994_v47 = vld [vmem:[%s4435_s1 + $0x150] ss:$8 sps:$4 sm:$0xff]  }
  0x2c   :  { %2074 = vmatpush1.bf16.msra.mxu0 %v2931_v48  ;;  %1911 = vmatprep.subr.bf16.mxu1 %v2932_v50  ;;  %v2997_v48 = vld [vmem:[%s4435_s1 + $0x550] ss:$8 sps:$4 sm:$0xff]   ;;  %v3002_v50 = vld [vmem:[%s4435_s1 + $0x164] ss:$8 sps:$4 sm:$0xff]  }
  0x2d   :  { %2075 = vmatprep.subr.bf16.mxu0 %v2934_v51  ;;  %v3005_v51 = vld [vmem:[%s4435_s1 + $0x564] ss:$8 sps:$4 sm:$0xff]  }
  0x2f   :  { %1912 = vmatpush1.bf16.msra.mxu1 %v2936_v53  ;;  %v3003_v53 = vld [vmem:[%s4435_s1 + $0x560] ss:$8 sps:$4 sm:$0xff]  }
  0x30   :  { %2076 = vmatpush1.bf16.msra.mxu0 %v2937_v55  ;;  %1913 = vmatprep.subr.bf16.mxu1 %v2938_v57  ;;  %v3011_v55 = vld [vmem:[%s4435_s1 + $0x574] ss:$8 sps:$4 sm:$0xff]   ;;  %v3009_v57 = vld [vmem:[%s4435_s1 + $0x570] ss:$8 sps:$4 sm:$0xff]  }
  0x31   :  { %2077 = vmatprep.subr.bf16.mxu0 %v2940_v58  ;;  %v3014_v58 = vld [vmem:[%s4435_s1 + $0x184] ss:$8 sps:$4 sm:$0xff]  }
  0x33   :  { %1914 = vmatpush1.bf16.msra.mxu1 %v2942_v63  ;;  %v3023_v63 = vld [vmem:[%s4435_s1 + $0x594] ss:$8 sps:$4 sm:$0xff]  }
  0x34   :  { %2078 = vmatpush1.bf16.msra.mxu0 %v2943_v0  ;;  %1915 = vmatprep.subr.bf16.mxu1 %v2944_v1  ;;  %v3018_v0 = vld [vmem:[%s4435_s1 + $0x190] ss:$8 sps:$4 sm:$0xff]  }
  0x35   :  { %2079 = vmatprep.subr.bf16.mxu0 %v2946_v2  ;;  %v3021_v1 = vld [vmem:[%s4435_s1 + $0x590] ss:$8 sps:$4 sm:$0xff]   ;;  %v3026_v2 = vld [vmem:[%s4435_s1 + $0x1a4] ss:$8 sps:$4 sm:$0xff]  }
  0x37   :  { %1916 = vmatpush1.bf16.msra.mxu1 %v2948_v4  ;;  %v3024_v4 = vld [vmem:[%s4435_s1 + $0x1a0] ss:$8 sps:$4 sm:$0xff]  }
  0x38   :  { %2080 = vmatpush1.bf16.msra.mxu0 %v2949_v5  ;;  %1917 = vmatprep.subr.bf16.mxu1 %v2950_v6  ;;  %v3027_v5 = vld [vmem:[%s4435_s1 + $0x5a0] ss:$8 sps:$4 sm:$0xff]   ;;  %v3032_v6 = vld [vmem:[%s4435_s1 + $0x1b4] ss:$8 sps:$4 sm:$0xff]  }
  0x39   :  { %2081 = vmatprep.subr.bf16.mxu0 %v2952_v7  ;;  %v3035_v7 = vld [vmem:[%s4435_s1 + $0x5b4] ss:$8 sps:$4 sm:$0xff]  }
  0x3b   :  { %1918 = vmatpush1.bf16.msra.mxu1 %v2954_v10  ;;  %v3038_v10 = vld [vmem:[%s4435_s1 + $0x1c4] ss:$8 sps:$4 sm:$0xff]  }
  0x3c   :  { %2082 = vmatpush1.bf16.msra.mxu0 %v2955_v11  ;;  %1919 = vmatprep.subr.bf16.mxu1 %v2956_v12  ;;  %v3041_v11 = vld [vmem:[%s4435_s1 + $0x5c4] ss:$8 sps:$4 sm:$0xff]   ;;  %v3036_v12 = vld [vmem:[%s4435_s1 + $0x1c0] ss:$8 sps:$4 sm:$0xff]  }
  0x3d   :  { %2083 = vmatprep.subr.bf16.mxu0 %v2958_v13  ;;  %v3039_v13 = vld [vmem:[%s4435_s1 + $0x5c0] ss:$8 sps:$4 sm:$0xff]  }
  0x3f   :  { %1920 = vmatpush1.bf16.msra.mxu1 %v2960_v16  ;;  %v3044_v16 = vld [vmem:[%s4435_s1 + $0x1d4] ss:$8 sps:$4 sm:$0xff]  }
  0x40   :  { %2084 = vmatpush1.bf16.msra.mxu0 %v2961_v17  ;;  %1930 = vmatprep.subr.bf16.mxu1 %v2965_v18  ;;  %v3047_v17 = vld [vmem:[%s4435_s1 + $0x5d4] ss:$8 sps:$4 sm:$0xff]   ;;  %v3042_v18 = vld [vmem:[%s4435_s1 + $0x1d0] ss:$8 sps:$4 sm:$0xff]  }
  0x41   :  { %2094 = vmatprep.subr.bf16.mxu0 %v2969_v19  ;;  %v3045_v19 = vld [vmem:[%s4435_s1 + $0x5d0] ss:$8 sps:$4 sm:$0xff]  }
  0x42   :  { %1922 = vmatmul.mubr.bf16.vlgmr.msra.gmra.mrb[0].mxu1 %v131_v22  ;;  %v3048_v22 = vld [vmem:[%s4435_s1 + $0x1e0] ss:$8 sps:$4 sm:$0xff]  }
  0x43   :  { %2086 = vmatmul.mubr.bf16.vlgmr.msra.gmra.mrb[0].mxu0 %v139_v23  ;;  %1931 = vmatpush1.bf16.msra.mxu1 %v2963_v24  ;;  %v3051_v23 = vld [vmem:[%s4435_s1 + $0x5e0] ss:$8 sps:$4 sm:$0xff]   ;;  %v3056_v24 = vld [vmem:[%s4435_s1 + $0x1f4] ss:$8 sps:$4 sm:$0xff]  }
  0x44   :  { %2095 = vmatpush1.bf16.msra.mxu0 %v2967_v25  ;;  %1932 = vmatprep.subr.bf16.mxu1 %v2972_v26  ;;  %v3059_v25 = vld [vmem:[%s4435_s1 + $0x5f4] ss:$8 sps:$4 sm:$0xff]   ;;  %v3054_v26 = vld [vmem:[%s4435_s1 + $0x1f0] ss:$8 sps:$4 sm:$0xff]  }
  0x45   :  { %2096 = vmatprep.subr.bf16.mxu0 %v2975_v27  ;;  %1962 = vmatprep.mubr.bf16.mxu1 %v134_v28  ;;  %v3057_v27 = vld [vmem:[%s4435_s1 + $0x5f0] ss:$8 sps:$4 sm:$0xff]   ;;  %v3062_v28 = vld [vmem:[%s4435_s1 + $0x204] ss:$8 sps:$4 sm:$0xff]  }
  0x46   :  { %2126 = vmatprep.mubr.bf16.mxu0 %v142_v29  ;;  %v3065_v29 = vld [vmem:[%s4435_s1 + $0x604] ss:$8 sps:$4 sm:$0xff]  }
  0x47   :  { %1933 = vmatpush1.bf16.msra.mxu1 %v2970_v30  ;;  %v3060_v30 = vld [vmem:[%s4435_s1 + $0x200] ss:$8 sps:$4 sm:$0xff]  }
  0x48   :  { %2097 = vmatpush1.bf16.msra.mxu0 %v2973_v31  ;;  %1934 = vmatprep.subr.bf16.mxu1 %v2978_v32  ;;  %v133_v31 = vpack.c.bf16 %v3575_v14, %v3575_v14  ;;  %v141_v32 = vpack.c.bf16 %v3578_v15, %v3578_v15  ;;  %v3071_v14 = vld [vmem:[%s4435_s1 + $0x614] ss:$8 sps:$4 sm:$0xff]  }
  0x49   :  { %2098 = vmatprep.subr.bf16.mxu0 %v2981_v33  ;;  %v3063_v33 = vld [vmem:[%s4435_s1 + $0x600] ss:$8 sps:$4 sm:$0xff]  }
  0x4b   :  { %1935 = vmatpush1.bf16.msra.mxu1 %v2976_v34  ;;  %v3068_v34 = vld [vmem:[%s4435_s1 + $0x214] ss:$8 sps:$4 sm:$0xff]  }
  0x4c   :  { %2099 = vmatpush1.bf16.msra.mxu0 %v2979_v35  ;;  %1936 = vmatprep.subr.bf16.mxu1 %v2984_v36  ;;  %v3806_v35 = vld [vmem:[%s4434_s0 + $0x8] sm:$0xff]  ;;  %v3818_v36 = vld [vmem:[%s4434_s0 + $0x18] sm:$0xff] }
  0x4d   :  { %2100 = vmatprep.subr.bf16.mxu0 %v2987_v37  ;;  %v3813_v15 = vrot.slane %v3806_v35, %v3506_v49  ;;  %v3066_v37 = vld [vmem:[%s4435_s1 + $0x210] ss:$8 sps:$4 sm:$0xff]  }
  0x4f   :  { %1937 = vmatpush1.bf16.msra.mxu1 %v2982_v38  ;;  %v3069_v38 = vld [vmem:[%s4435_s1 + $0x610] ss:$8 sps:$4 sm:$0xff]  }
  0x50   :  { %2101 = vmatpush1.bf16.msra.mxu0 %v2985_v39  ;;  %1938 = vmatprep.subr.bf16.mxu1 %v2990_v40  ;;  %v69_v39 = vcombine.high %v3813_v15, %v3813_v15  ;;  %v3830_v40 = vrot.slane %v3818_v36, %v3506_v49 }
  0x51   :  { %2102 = vmatprep.subr.bf16.mxu0 %v2993_v41  ;;  %v3074_v41 = vld [vmem:[%s4435_s1 + $0x224] ss:$8 sps:$4 sm:$0xff]  }
  0x53   :  { %1939 = vmatpush1.bf16.msra.mxu1 %v2988_v42  ;;  %v3077_v42 = vld [vmem:[%s4435_s1 + $0x624] ss:$8 sps:$4 sm:$0xff]  }
  0x54   :  { %2103 = vmatpush1.bf16.msra.mxu0 %v2991_v44  ;;  %1940 = vmatprep.subr.bf16.mxu1 %v2996_v45  ;;  %v136_v44 = vpack.c.bf16 %v69_v39, %v69_v39  ;;  %v103_v45 = vcombine.high %v3830_v40, %v3830_v40  ;;  %v3152_v39 = vld [vmem:[%s4435_s1 + $0x2f4] ss:$8 sps:$4 sm:$0xff]  }
  0x55   :  { %2104 = vmatprep.subr.bf16.mxu0 %v2999_v46  ;;  %v3072_v46 = vld [vmem:[%s4435_s1 + $0x220] ss:$8 sps:$4 sm:$0xff]  }
  0x57   :  { %1941 = vmatpush1.bf16.msra.mxu1 %v2994_v47  ;;  %v3075_v47 = vld [vmem:[%s4435_s1 + $0x620] ss:$8 sps:$4 sm:$0xff]  }
  0x58   :  { %2105 = vmatpush1.bf16.msra.mxu0 %v2997_v48  ;;  %1942 = vmatprep.subr.bf16.mxu1 %v3002_v50  ;;  %v144_v48 = vpack.c.bf16 %v103_v45, %v103_v45  ;;  %v3080_v50 = vld [vmem:[%s4435_s1 + $0x234] ss:$8 sps:$4 sm:$0xff]   ;;  %v3158_v45 = vld [vmem:[%s4435_s1 + $0x304] ss:$8 sps:$4 sm:$0xff]  }
  0x59   :  { %2106 = vmatprep.subr.bf16.mxu0 %v3005_v51  ;;  %v3083_v51 = vld [vmem:[%s4435_s1 + $0x634] ss:$8 sps:$4 sm:$0xff]  }
  0x5b   :  { %1943 = vmatpush1.bf16.msra.mxu1 %v3000_v52  ;;  %v3078_v52 = vld [vmem:[%s4435_s1 + $0x230] ss:$8 sps:$4 sm:$0xff]  }
  0x5c   :  { %2107 = vmatpush1.bf16.msra.mxu0 %v3003_v53  ;;  %1944 = vmatprep.subr.bf16.mxu1 %v3008_v54  ;;  %v3081_v53 = vld [vmem:[%s4435_s1 + $0x630] ss:$8 sps:$4 sm:$0xff]   ;;  %v3086_v54 = vld [vmem:[%s4435_s1 + $0x244] ss:$8 sps:$4 sm:$0xff]  }
  0x5d   :  { %2108 = vmatprep.subr.bf16.mxu0 %v3011_v55  ;;  %v3089_v55 = vld [vmem:[%s4435_s1 + $0x644] ss:$8 sps:$4 sm:$0xff]  }
  0x5f   :  { %1945 = vmatpush1.bf16.msra.mxu1 %v3006_v56  ;;  %v3084_v56 = vld [vmem:[%s4435_s1 + $0x240] ss:$8 sps:$4 sm:$0xff]  }
  0x60   :  { %2109 = vmatpush1.bf16.msra.mxu0 %v3009_v57  ;;  %1946 = vmatprep.subr.bf16.mxu1 %v3014_v58  ;;  %v3087_v57 = vld [vmem:[%s4435_s1 + $0x640] ss:$8 sps:$4 sm:$0xff]   ;;  %v3092_v58 = vld [vmem:[%s4435_s1 + $0x254] ss:$8 sps:$4 sm:$0xff]  }
  0x61   :  { %2110 = vmatprep.subr.bf16.mxu0 %v3017_v59  ;;  %v3095_v59 = vld [vmem:[%s4435_s1 + $0x654] ss:$8 sps:$4 sm:$0xff]  }
  0x63   :  { %1947 = vmatpush1.bf16.msra.mxu1 %v3012_v60  ;;  %v3090_v60 = vld [vmem:[%s4435_s1 + $0x250] ss:$8 sps:$4 sm:$0xff]  }
  0x64   :  { %2111 = vmatpush1.bf16.msra.mxu0 %v3015_v61  ;;  %1948 = vmatprep.subr.bf16.mxu1 %v3020_v62  ;;  %v3093_v61 = vld [vmem:[%s4435_s1 + $0x650] ss:$8 sps:$4 sm:$0xff]   ;;  %v3098_v62 = vld [vmem:[%s4435_s1 + $0x264] ss:$8 sps:$4 sm:$0xff]  }
  0x65   :  { %2112 = vmatprep.subr.bf16.mxu0 %v3023_v63  ;;  %v3101_v63 = vld [vmem:[%s4435_s1 + $0x664] ss:$8 sps:$4 sm:$0xff]  }
  0x67   :  { %1949 = vmatpush1.bf16.msra.mxu1 %v3018_v0  ;;  %v3096_v0 = vld [vmem:[%s4435_s1 + $0x260] ss:$8 sps:$4 sm:$0xff]  }
  0x68   :  { %2113 = vmatpush1.bf16.msra.mxu0 %v3021_v1  ;;  %1950 = vmatprep.subr.bf16.mxu1 %v3026_v2  ;;  %v3099_v1 = vld [vmem:[%s4435_s1 + $0x660] ss:$8 sps:$4 sm:$0xff]   ;;  %v3104_v2 = vld [vmem:[%s4435_s1 + $0x274] ss:$8 sps:$4 sm:$0xff]  }
  0x69   :  { %2114 = vmatprep.subr.bf16.mxu0 %v3029_v3  ;;  %v3107_v3 = vld [vmem:[%s4435_s1 + $0x674] ss:$8 sps:$4 sm:$0xff]  }
  0x6b   :  { %1951 = vmatpush1.bf16.msra.mxu1 %v3024_v4  ;;  %v3102_v4 = vld [vmem:[%s4435_s1 + $0x270] ss:$8 sps:$4 sm:$0xff]  }
  0x6c   :  { %2115 = vmatpush1.bf16.msra.mxu0 %v3027_v5  ;;  %1952 = vmatprep.subr.bf16.mxu1 %v3032_v6  ;;  %v3105_v5 = vld [vmem:[%s4435_s1 + $0x670] ss:$8 sps:$4 sm:$0xff]   ;;  %v3110_v6 = vld [vmem:[%s4435_s1 + $0x284] ss:$8 sps:$4 sm:$0xff]  }
  0x6d   :  { %2116 = vmatprep.subr.bf16.mxu0 %v3035_v7  ;;  %v3113_v7 = vld [vmem:[%s4435_s1 + $0x684] ss:$8 sps:$4 sm:$0xff]  }
  0x6f   :  { %1953 = vmatpush1.bf16.msra.mxu1 %v3030_v8  ;;  %v3108_v8 = vld [vmem:[%s4435_s1 + $0x280] ss:$8 sps:$4 sm:$0xff]  }
  0x70   :  { %2117 = vmatpush1.bf16.msra.mxu0 %v3033_v9  ;;  %1954 = vmatprep.subr.bf16.mxu1 %v3038_v10  ;;  %v3111_v9 = vld [vmem:[%s4435_s1 + $0x680] ss:$8 sps:$4 sm:$0xff]   ;;  %v3116_v10 = vld [vmem:[%s4435_s1 + $0x294] ss:$8 sps:$4 sm:$0xff]  }
  0x71   :  { %2118 = vmatprep.subr.bf16.mxu0 %v3041_v11  ;;  %v3119_v11 = vld [vmem:[%s4435_s1 + $0x694] ss:$8 sps:$4 sm:$0xff]  }
  0x73   :  { %1955 = vmatpush1.bf16.msra.mxu1 %v3036_v12  ;;  %v3114_v12 = vld [vmem:[%s4435_s1 + $0x290] ss:$8 sps:$4 sm:$0xff]  }
  0x74   :  { %2119 = vmatpush1.bf16.msra.mxu0 %v3039_v13  ;;  %1956 = vmatprep.subr.bf16.mxu1 %v3044_v16  ;;  %v3117_v13 = vld [vmem:[%s4435_s1 + $0x690] ss:$8 sps:$4 sm:$0xff]   ;;  %v3122_v16 = vld [vmem:[%s4435_s1 + $0x2a4] ss:$8 sps:$4 sm:$0xff]  }
  0x75   :  { %2120 = vmatprep.subr.bf16.mxu0 %v3047_v17  ;;  %v3125_v17 = vld [vmem:[%s4435_s1 + $0x6a4] ss:$8 sps:$4 sm:$0xff]  }
  0x77   :  { %1957 = vmatpush1.bf16.msra.mxu1 %v3042_v18  ;;  %v3120_v18 = vld [vmem:[%s4435_s1 + $0x2a0] ss:$8 sps:$4 sm:$0xff]  }
  0x78   :  { %2121 = vmatpush1.bf16.msra.mxu0 %v3045_v19  ;;  %1958 = vmatprep.subr.bf16.mxu1 %v3050_v20  ;;  %v3123_v19 = vld [vmem:[%s4435_s1 + $0x6a0] ss:$8 sps:$4 sm:$0xff]   ;;  %v3128_v20 = vld [vmem:[%s4435_s1 + $0x2b4] ss:$8 sps:$4 sm:$0xff]  }
  0x79   :  { %2122 = vmatprep.subr.bf16.mxu0 %v3053_v21  ;;  %v3131_v21 = vld [vmem:[%s4435_s1 + $0x6b4] ss:$8 sps:$4 sm:$0xff]  }
  0x7b   :  { %1959 = vmatpush1.bf16.msra.mxu1 %v3048_v22  ;;  %v3126_v22 = vld [vmem:[%s4435_s1 + $0x2b0] ss:$8 sps:$4 sm:$0xff]  }
  0x7c   :  { %2123 = vmatpush1.bf16.msra.mxu0 %v3051_v23  ;;  %1960 = vmatprep.subr.bf16.mxu1 %v3056_v24  ;;  %v3129_v23 = vld [vmem:[%s4435_s1 + $0x6b0] ss:$8 sps:$4 sm:$0xff]   ;;  %v3134_v24 = vld [vmem:[%s4435_s1 + $0x2c4] ss:$8 sps:$4 sm:$0xff]  }
  0x7d   :  { %2124 = vmatprep.subr.bf16.mxu0 %v3059_v25  ;;  %v3137_v25 = vld [vmem:[%s4435_s1 + $0x6c4] ss:$8 sps:$4 sm:$0xff]  }
  0x7f   :  { %1961 = vmatpush1.bf16.msra.mxu1 %v3054_v26  ;;  %v3132_v26 = vld [vmem:[%s4435_s1 + $0x2c0] ss:$8 sps:$4 sm:$0xff]  }
  0x80   :  { %2125 = vmatpush1.bf16.msra.mxu0 %v3057_v27  ;;  %1971 = vmatprep.subr.bf16.mxu1 %v3062_v28  ;;  %v3135_v27 = vld [vmem:[%s4435_s1 + $0x6c0] ss:$8 sps:$4 sm:$0xff]   ;;  %v3140_v28 = vld [vmem:[%s4435_s1 + $0x2d4] ss:$8 sps:$4 sm:$0xff]  }
  0x81   :  { %2135 = vmatprep.subr.bf16.mxu0 %v3065_v29  ;;  %v3143_v29 = vld [vmem:[%s4435_s1 + $0x6d4] ss:$8 sps:$4 sm:$0xff]  }
  0x82   :  { %1963 = vmatmul.mubr.bf16.vlgmr.msra.gmra.mrb[0].mxu1 %v133_v31  ;;  %v3141_v31 = vld [vmem:[%s4435_s1 + $0x6d0] ss:$8 sps:$4 sm:$0xff]  }
  0x83   :  { %2127 = vmatmul.mubr.bf16.vlgmr.msra.gmra.mrb[0].mxu0 %v141_v32  ;;  %1972 = vmatpush1.bf16.msra.mxu1 %v3060_v30  ;;  %v3138_v30 = vld [vmem:[%s4435_s1 + $0x2d0] ss:$8 sps:$4 sm:$0xff]   ;;  %v3146_v32 = vld [vmem:[%s4435_s1 + $0x2e4] ss:$8 sps:$4 sm:$0xff]  }
  0x84   :  { %2136 = vmatpush1.bf16.msra.mxu0 %v3063_v33  ;;  %1973 = vmatprep.subr.bf16.mxu1 %v3068_v34  ;;  %v3149_v33 = vld [vmem:[%s4435_s1 + $0x6e4] ss:$8 sps:$4 sm:$0xff]   ;;  %v54_v34 = vcombine.high %v3806_v35, %v3806_v35  ;;  %v3155_v35 = vld [vmem:[%s4435_s1 + $0x6f4] ss:$8 sps:$4 sm:$0xff]  }
  0x85   :  { %2137 = vmatprep.subr.bf16.mxu0 %v3071_v14  ;;  %2003 = vmatprep.mubr.bf16.mxu1 %v136_v44  ;;  %v88_v14 = vcombine.high %v3818_v36, %v3818_v36  ;;  %v3153_v44 = vld [vmem:[%s4435_s1 + $0x6f0] ss:$8 sps:$4 sm:$0xff]  }
  0x86   :  { %2167 = vmatprep.mubr.bf16.mxu0 %v144_v48  ;;  %v4001_v36 = vrot.slane %v54_v34, %v3506_v49  ;;  %v3156_v48 = vld [vmem:[%s4435_s1 + $0x300] ss:$8 sps:$4 sm:$0xff]  }
  0x87   :  { %1974 = vmatpush1.bf16.msra.mxu1 %v3066_v37  ;;  %v3144_v37 = vld [vmem:[%s4435_s1 + $0x2e0] ss:$8 sps:$4 sm:$0xff]  }
  0x88   :  { %2138 = vmatpush1.bf16.msra.mxu0 %v3069_v38  ;;  %1975 = vmatprep.subr.bf16.mxu1 %v3074_v41  ;;  %v3147_v38 = vld [vmem:[%s4435_s1 + $0x6e0] ss:$8 sps:$4 sm:$0xff]   ;;  %v4004_v41 = vrot.slane %v88_v14, %v3506_v49  ;;  %v3161_v49 = vld [vmem:[%s4435_s1 + $0x704] ss:$8 sps:$4 sm:$0xff]  }
  0x89   :  { %2139 = vmatprep.subr.bf16.mxu0 %v3077_v42  ;;  %v3150_v42 = vld [vmem:[%s4435_s1 + $0x2f0] ss:$8 sps:$4 sm:$0xff]  }
  0x8b   :  { %1976 = vmatpush1.bf16.msra.mxu1 %v3072_v46  ;;  %v70_v46 = vcombine.high %v4001_v36, %v4001_v36 }
  0x8c   :  { %2140 = vmatpush1.bf16.msra.mxu0 %v3075_v47  ;;  %1977 = vmatprep.subr.bf16.mxu1 %v3080_v50  ;;  %v104_v47 = vcombine.high %v4004_v41, %v4004_v41  ;;  %v135_v50 = vpack.c.bf16 %v3813_v15, %v3813_v15 }
  0x8d   :  { %2141 = vmatprep.subr.bf16.mxu0 %v3083_v51  ;;  %v143_v51 = vpack.c.bf16 %v3830_v40, %v3830_v40  ;;  %v138_v15 = vpack.c.bf16 %v70_v46, %v70_v46 }
  0x8f   :  { %1978 = vmatpush1.bf16.msra.mxu1 %v3078_v52  ;;  %v3159_v52 = vld [vmem:[%s4435_s1 + $0x700] ss:$8 sps:$4 sm:$0xff]  }
  0x90   :  { %2142 = vmatpush1.bf16.msra.mxu0 %v3081_v53  ;;  %1979 = vmatprep.subr.bf16.mxu1 %v3086_v54  ;;  %v3164_v53 = vld [vmem:[%s4435_s1 + $0x314] ss:$8 sps:$4 sm:$0xff]  }
  0x91   :  { %2143 = vmatprep.subr.bf16.mxu0 %v3089_v55  ;;  %v3167_v54 = vld [vmem:[%s4435_s1 + $0x714] ss:$8 sps:$4 sm:$0xff]   ;;  %v146_v55 = vpack.c.bf16 %v104_v47, %v104_v47 }
  0x93   :  { %1980 = vmatpush1.bf16.msra.mxu1 %v3084_v56 }
  0x94   :  { %2144 = vmatpush1.bf16.msra.mxu0 %v3087_v57  ;;  %1981 = vmatprep.subr.bf16.mxu1 %v3092_v58 }
  0x95   :  { %2145 = vmatprep.subr.bf16.mxu0 %v3095_v59 }
  0x97   :  { %1982 = vmatpush1.bf16.msra.mxu1 %v3090_v60 }
  0x98   :  { %2146 = vmatpush1.bf16.msra.mxu0 %v3093_v61  ;;  %1983 = vmatprep.subr.bf16.mxu1 %v3098_v62 }
  0x99   :  { %2147 = vmatprep.subr.bf16.mxu0 %v3101_v63 }
  0x9b   :  { %1984 = vmatpush1.bf16.msra.mxu1 %v3096_v0 }
  0x9c   :  { %2148 = vmatpush1.bf16.msra.mxu0 %v3099_v1  ;;  %1985 = vmatprep.subr.bf16.mxu1 %v3104_v2 }
  0x9d   :  { %2149 = vmatprep.subr.bf16.mxu0 %v3107_v3 }
  0x9f   :  { %1986 = vmatpush1.bf16.msra.mxu1 %v3102_v4 }
  0xa0   :  { %2150 = vmatpush1.bf16.msra.mxu0 %v3105_v5  ;;  %1987 = vmatprep.subr.bf16.mxu1 %v3110_v6 }
  0xa1   :  { %2151 = vmatprep.subr.bf16.mxu0 %v3113_v7 }
  0xa3   :  { %1988 = vmatpush1.bf16.msra.mxu1 %v3108_v8 }
  0xa4   :  { %2152 = vmatpush1.bf16.msra.mxu0 %v3111_v9  ;;  %1989 = vmatprep.subr.bf16.mxu1 %v3116_v10 }
  0xa5   :  { %2153 = vmatprep.subr.bf16.mxu0 %v3119_v11 }
  0xa7   :  { %1990 = vmatpush1.bf16.msra.mxu1 %v3114_v12 }
  0xa8   :  { %2154 = vmatpush1.bf16.msra.mxu0 %v3117_v13  ;;  %1991 = vmatprep.subr.bf16.mxu1 %v3122_v16 }
  0xa9   :  { %2155 = vmatprep.subr.bf16.mxu0 %v3125_v17 }
  0xab   :  { %1992 = vmatpush1.bf16.msra.mxu1 %v3120_v18 }
  0xac   :  { %2156 = vmatpush1.bf16.msra.mxu0 %v3123_v19  ;;  %1993 = vmatprep.subr.bf16.mxu1 %v3128_v20 }
  0xad   :  { %2157 = vmatprep.subr.bf16.mxu0 %v3131_v21 }
  0xaf   :  { %1994 = vmatpush1.bf16.msra.mxu1 %v3126_v22 }
  0xb0   :  { %2158 = vmatpush1.bf16.msra.mxu0 %v3129_v23  ;;  %1995 = vmatprep.subr.bf16.mxu1 %v3134_v24 }
  0xb1   :  { %2159 = vmatprep.subr.bf16.mxu0 %v3137_v25 }
  0xb3   :  { %1996 = vmatpush1.bf16.msra.mxu1 %v3132_v26 }
  0xb4   :  { %2160 = vmatpush1.bf16.msra.mxu0 %v3135_v27  ;;  %1997 = vmatprep.subr.bf16.mxu1 %v3140_v28 }
  0xb5   :  { %2161 = vmatprep.subr.bf16.mxu0 %v3143_v29 }
  0xb7   :  { %1998 = vmatpush1.bf16.msra.mxu1 %v3138_v30 }
  0xb8   :  { %2162 = vmatpush1.bf16.msra.mxu0 %v3141_v31  ;;  %1999 = vmatprep.subr.bf16.mxu1 %v3146_v32 }
  0xb9   :  { %2163 = vmatprep.subr.bf16.mxu0 %v3149_v33 }
  0xbb   :  { %2000 = vmatpush1.bf16.msra.mxu1 %v3144_v37 }
  0xbc   :  { %2164 = vmatpush1.bf16.msra.mxu0 %v3147_v38  ;;  %2001 = vmatprep.subr.bf16.mxu1 %v3152_v39 }
  0xbd   :  { %2165 = vmatprep.subr.bf16.mxu0 %v3155_v35 }
  0xbf   :  { %2002 = vmatpush1.bf16.msra.mxu1 %v3150_v42 }
  0xc0   :  { %2166 = vmatpush1.bf16.msra.mxu0 %v3153_v44  ;;  %2012 = vmatprep.subr.bf16.mxu1 %v3158_v45 }
  0xc1   :  { %2176 = vmatprep.subr.bf16.mxu0 %v3161_v49 }
  0xc2   :  { %12 = vsyncpa [#allocation3], 0  ;;  %2004 = vmatmul.mubr.bf16.vlgmr.msra.gmra.mrb[0].mxu1 %v135_v50  ;;  %v3162_v40 = vld [vmem:[%s4435_s1 + $0x310] ss:$8 sps:$4 sm:$0xff]   ;;  %v3170_v57 = vld [vmem:[%s4435_s1 + $0x324] ss:$8 sps:$4 sm:$0xff]  }
  0xc3   :  { %2168 = vmatmul.mubr.bf16.vlgmr.msra.gmra.mrb[0].mxu0 %v143_v51  ;;  %2013 = vmatpush1.bf16.msra.mxu1 %v3156_v48  ;;  %v3165_v56 = vld [vmem:[%s4435_s1 + $0x710] ss:$8 sps:$4 sm:$0xff]   ;;  %v3173_v58 = vld [vmem:[%s4435_s1 + $0x724] ss:$8 sps:$4 sm:$0xff]   ;;  %v3168_v59 = vld [vmem:[%s4435_s1 + $0x320] ss:$8 sps:$4 sm:$0xff]  }
  0xc4   :  { %2177 = vmatpush1.bf16.msra.mxu0 %v3159_v52  ;;  %2014 = vmatprep.subr.bf16.mxu1 %v3164_v53  ;;  %v3171_v60 = vld [vmem:[%s4435_s1 + $0x720] ss:$8 sps:$4 sm:$0xff]   ;;  %v3176_v61 = vld [vmem:[%s4435_s1 + $0x334] ss:$8 sps:$4 sm:$0xff]   ;;  %v3174_v63 = vld [vmem:[%s4435_s1 + $0x330] ss:$8 sps:$4 sm:$0xff]  }
  0xc5   :  { %2178 = vmatprep.subr.bf16.mxu0 %v3167_v54  ;;  %2044 = vmatprep.mubr.bf16.mxu1 %v138_v15  ;;  %v3179_v62 = vld [vmem:[%s4435_s1 + $0x734] ss:$8 sps:$4 sm:$0xff]   ;;  %v3177_v0 = vld [vmem:[%s4435_s1 + $0x730] ss:$8 sps:$4 sm:$0xff]   ;;  %v3182_v1 = vld [vmem:[%s4435_s1 + $0x344] ss:$8 sps:$4 sm:$0xff]  }
  0xc6   :  { %2208 = vmatprep.mubr.bf16.mxu0 %v146_v55  ;;  %v3185_v2 = vld [vmem:[%s4435_s1 + $0x744] ss:$8 sps:$4 sm:$0xff]   ;;  %v3180_v3 = vld [vmem:[%s4435_s1 + $0x340] ss:$8 sps:$4 sm:$0xff]   ;;  %v3188_v5 = vld [vmem:[%s4435_s1 + $0x354] ss:$8 sps:$4 sm:$0xff]  }
  0xc7   :  { %2015 = vmatpush1.bf16.msra.mxu1 %v3162_v40  ;;  %v3183_v4 = vld [vmem:[%s4435_s1 + $0x740] ss:$8 sps:$4 sm:$0xff]   ;;  %v3191_v6 = vld [vmem:[%s4435_s1 + $0x754] ss:$8 sps:$4 sm:$0xff]   ;;  %v3186_v7 = vld [vmem:[%s4435_s1 + $0x350] ss:$8 sps:$4 sm:$0xff]   ;;  %v137_v40 = vpack.c.bf16 %v4001_v36, %v4001_v36 }
  0xc8   :  { %2179 = vmatpush1.bf16.msra.mxu0 %v3165_v56  ;;  %2016 = vmatprep.subr.bf16.mxu1 %v3170_v57  ;;  %v3189_v8 = vld [vmem:[%s4435_s1 + $0x750] ss:$8 sps:$4 sm:$0xff]   ;;  %v3194_v9 = vld [vmem:[%s4435_s1 + $0x364] ss:$8 sps:$4 sm:$0xff]   ;;  %v3192_v11 = vld [vmem:[%s4435_s1 + $0x360] ss:$8 sps:$4 sm:$0xff]   ;;  %v145_v56 = vpack.c.bf16 %v4004_v41, %v4004_v41 }
  0xc9   :  { %2180 = vmatprep.subr.bf16.mxu0 %v3173_v58  ;;  %v3197_v10 = vld [vmem:[%s4435_s1 + $0x764] ss:$8 sps:$4 sm:$0xff]   ;;  %v3195_v12 = vld [vmem:[%s4435_s1 + $0x760] ss:$8 sps:$4 sm:$0xff]   ;;  %v3200_v13 = vld [vmem:[%s4435_s1 + $0x374] ss:$8 sps:$4 sm:$0xff]  }
  0xca   :  { %v3203_v16 = vld [vmem:[%s4435_s1 + $0x774] ss:$8 sps:$4 sm:$0xff]   ;;  %v3198_v17 = vld [vmem:[%s4435_s1 + $0x370] ss:$8 sps:$4 sm:$0xff]   ;;  %v3206_v19 = vld [vmem:[%s4435_s1 + $0x384] ss:$8 sps:$4 sm:$0xff]  }
  0xcb   :  { %2017 = vmatpush1.bf16.msra.mxu1 %v3168_v59  ;;  %v3201_v18 = vld [vmem:[%s4435_s1 + $0x770] ss:$8 sps:$4 sm:$0xff]   ;;  %v3209_v20 = vld [vmem:[%s4435_s1 + $0x784] ss:$8 sps:$4 sm:$0xff]   ;;  %v3204_v21 = vld [vmem:[%s4435_s1 + $0x380] ss:$8 sps:$4 sm:$0xff]  }
  0xcc   :  { %2181 = vmatpush1.bf16.msra.mxu0 %v3171_v60  ;;  %2018 = vmatprep.subr.bf16.mxu1 %v3176_v61  ;;  %v3207_v22 = vld [vmem:[%s4435_s1 + $0x780] ss:$8 sps:$4 sm:$0xff]   ;;  %v3212_v23 = vld [vmem:[%s4435_s1 + $0x394] ss:$8 sps:$4 sm:$0xff]   ;;  %v3210_v25 = vld [vmem:[%s4435_s1 + $0x390] ss:$8 sps:$4 sm:$0xff]  }
  0xcd   :  { %2182 = vmatprep.subr.bf16.mxu0 %v3179_v62  ;;  %v3215_v24 = vld [vmem:[%s4435_s1 + $0x794] ss:$8 sps:$4 sm:$0xff]   ;;  %v3213_v26 = vld [vmem:[%s4435_s1 + $0x790] ss:$8 sps:$4 sm:$0xff]   ;;  %v3218_v27 = vld [vmem:[%s4435_s1 + $0x3a4] ss:$8 sps:$4 sm:$0xff]  }
  0xce   :  { %v3221_v28 = vld [vmem:[%s4435_s1 + $0x7a4] ss:$8 sps:$4 sm:$0xff]   ;;  %v3216_v29 = vld [vmem:[%s4435_s1 + $0x3a0] ss:$8 sps:$4 sm:$0xff]   ;;  %v3224_v31 = vld [vmem:[%s4435_s1 + $0x3b4] ss:$8 sps:$4 sm:$0xff]  }
  0xcf   :  { %2019 = vmatpush1.bf16.msra.mxu1 %v3174_v63  ;;  %v3219_v30 = vld [vmem:[%s4435_s1 + $0x7a0] ss:$8 sps:$4 sm:$0xff]   ;;  %v3227_v32 = vld [vmem:[%s4435_s1 + $0x7b4] ss:$8 sps:$4 sm:$0xff]   ;;  %v3222_v33 = vld [vmem:[%s4435_s1 + $0x3b0] ss:$8 sps:$4 sm:$0xff]  }
  0xd0   :  { %2183 = vmatpush1.bf16.msra.mxu0 %v3177_v0  ;;  %2020 = vmatprep.subr.bf16.mxu1 %v3182_v1  ;;  %v3225_v34 = vld [vmem:[%s4435_s1 + $0x7b0] ss:$8 sps:$4 sm:$0xff]   ;;  %v3230_v14 = vld [vmem:[%s4435_s1 + $0x3c4] ss:$8 sps:$4 sm:$0xff]   ;;  %v3228_v38 = vld [vmem:[%s4435_s1 + $0x3c0] ss:$8 sps:$4 sm:$0xff]  }
  0xd1   :  { %2184 = vmatprep.subr.bf16.mxu0 %v3185_v2  ;;  %v3233_v37 = vld [vmem:[%s4435_s1 + $0x7c4] ss:$8 sps:$4 sm:$0xff]   ;;  %v3231_v39 = vld [vmem:[%s4435_s1 + $0x7c0] ss:$8 sps:$4 sm:$0xff]   ;;  %v3236_v35 = vld [vmem:[%s4435_s1 + $0x3d4] ss:$8 sps:$4 sm:$0xff]  }
  0xd2   :  { %v3239_v42 = vld [vmem:[%s4435_s1 + $0x7d4] ss:$8 sps:$4 sm:$0xff]   ;;  %v3234_v44 = vld [vmem:[%s4435_s1 + $0x3d0] ss:$8 sps:$4 sm:$0xff]   ;;  %v3242_v49 = vld [vmem:[%s4435_s1 + $0x3e4] ss:$8 sps:$4 sm:$0xff]  }
  0xd3   :  { %2021 = vmatpush1.bf16.msra.mxu1 %v3180_v3  ;;  %v3237_v45 = vld [vmem:[%s4435_s1 + $0x7d0] ss:$8 sps:$4 sm:$0xff]   ;;  %v3245_v46 = vld [vmem:[%s4435_s1 + $0x7e4] ss:$8 sps:$4 sm:$0xff]   ;;  %v3240_v47 = vld [vmem:[%s4435_s1 + $0x3e0] ss:$8 sps:$4 sm:$0xff]  }
  0xd4   :  { %2185 = vmatpush1.bf16.msra.mxu0 %v3183_v4  ;;  %2022 = vmatprep.subr.bf16.mxu1 %v3188_v5  ;;  %v3243_v48 = vld [vmem:[%s4435_s1 + $0x7e0] ss:$8 sps:$4 sm:$0xff]   ;;  %v3248_v50 = vld [vmem:[%s4435_s1 + $0x3f4] ss:$8 sps:$4 sm:$0xff]   ;;  %v3246_v53 = vld [vmem:[%s4435_s1 + $0x3f0] ss:$8 sps:$4 sm:$0xff]  }
  0xd5   :  { %2186 = vmatprep.subr.bf16.mxu0 %v3191_v6  ;;  %v3251_v51 = vld [vmem:[%s4435_s1 + $0x7f4] ss:$8 sps:$4 sm:$0xff]   ;;  %v4209_v52 = vld.sshfl [vmem:[%s4434_s0 + $0x20] sm:$0x33 pattern:$0x76325410] }
  0xd6   :  { %v3249_v54 = vld [vmem:[%s4435_s1 + $0x7f0] ss:$8 sps:$4 sm:$0xff]   ;;  %v112_v15 = vcombine.high %v4209_v52, %v4209_v52  ;;  %v3256_v55 = vld [vmem:[%s4435_s1 + $0x804] ss:$8 sps:$4 sm:$0xff]   ;;  %v3254_v57 = vld [vmem:[%s4435_s1 + $0x800] ss:$8 sps:$4 sm:$0xff]  }
  0xd7   :  { %2023 = vmatpush1.bf16.msra.mxu1 %v3186_v7  ;;  %v3259_v59 = vld [vmem:[%s4435_s1 + $0x814] ss:$8 sps:$4 sm:$0xff]   ;;  %v3257_v36 = vld [vmem:[%s4435_s1 + $0x810] ss:$8 sps:$4 sm:$0xff]   ;;  %v3262_v41 = vld [vmem:[%s4435_s1 + $0x824] ss:$8 sps:$4 sm:$0xff]  }
  0xd8   :  { %2187 = vmatpush1.bf16.msra.mxu0 %v3189_v8  ;;  %2024 = vmatprep.subr.bf16.mxu1 %v3194_v9  ;;  %v148_v58 = vpack.c.bf16 %v112_v15, %v112_v15  ;;  %v3260_v60 = vld [vmem:[%s4435_s1 + $0x820] ss:$8 sps:$4 sm:$0xff]   ;;  %v3265_v61 = vld [vmem:[%s4435_s1 + $0x834] ss:$8 sps:$4 sm:$0xff]   ;;  %v3263_v62 = vld [vmem:[%s4435_s1 + $0x830] ss:$8 sps:$4 sm:$0xff]  }
  0xd9   :  { %2188 = vmatprep.subr.bf16.mxu0 %v3197_v10  ;;  %v3268_v63 = vld [vmem:[%s4435_s1 + $0x844] ss:$8 sps:$4 sm:$0xff]   ;;  %v3266_v0 = vld [vmem:[%s4435_s1 + $0x840] ss:$8 sps:$4 sm:$0xff]   ;;  %v3271_v1 = vld [vmem:[%s4435_s1 + $0x854] ss:$8 sps:$4 sm:$0xff]  }
  0xda   :  { %v3269_v2 = vld [vmem:[%s4435_s1 + $0x850] ss:$8 sps:$4 sm:$0xff]   ;;  %v3274_v3 = vld [vmem:[%s4435_s1 + $0x864] ss:$8 sps:$4 sm:$0xff]   ;;  %v3272_v4 = vld [vmem:[%s4435_s1 + $0x860] ss:$8 sps:$4 sm:$0xff]  }
  0xdb   :  { %2025 = vmatpush1.bf16.msra.mxu1 %v3192_v11  ;;  %v3277_v5 = vld [vmem:[%s4435_s1 + $0x874] ss:$8 sps:$4 sm:$0xff]   ;;  %v3275_v6 = vld [vmem:[%s4435_s1 + $0x870] ss:$8 sps:$4 sm:$0xff]   ;;  %v3280_v7 = vld [vmem:[%s4435_s1 + $0x884] ss:$8 sps:$4 sm:$0xff]  }
  0xdc   :  { %2189 = vmatpush1.bf16.msra.mxu0 %v3195_v12  ;;  %2026 = vmatprep.subr.bf16.mxu1 %v3200_v13  ;;  %v3278_v8 = vld [vmem:[%s4435_s1 + $0x880] ss:$8 sps:$4 sm:$0xff]   ;;  %v3283_v9 = vld [vmem:[%s4435_s1 + $0x894] ss:$8 sps:$4 sm:$0xff]   ;;  %v3281_v10 = vld [vmem:[%s4435_s1 + $0x890] ss:$8 sps:$4 sm:$0xff]  }
  0xdd   :  { %2190 = vmatprep.subr.bf16.mxu0 %v3203_v16  ;;  %v3286_v11 = vld [vmem:[%s4435_s1 + $0x8a4] ss:$8 sps:$4 sm:$0xff]   ;;  %v3284_v12 = vld [vmem:[%s4435_s1 + $0x8a0] ss:$8 sps:$4 sm:$0xff]   ;;  %v3289_v13 = vld [vmem:[%s4435_s1 + $0x8b4] ss:$8 sps:$4 sm:$0xff]  }
  0xde   :  { %v3287_v16 = vld [vmem:[%s4435_s1 + $0x8b0] ss:$8 sps:$4 sm:$0xff]   ;;  %v2277_v15 = vld [vmem:[%s4437_s3 + $0x88] sm:$0xff]  ;;  %vm2290_vm0 = vcmask 1045504   ;;  %vm2286_vm1 = vcmask 179200   ;;  %vm2383_vm2 = vcmask 1041408  }
  0xdf   :  { %2027 = vmatpush1.bf16.msra.mxu1 %v3198_v17  ;;  %v3292_v17 = vld [vmem:[%s4435_s1 + $0x8c4] ss:$8 sps:$4 sm:$0xff]   ;;  %vm3329_vm3 = vmmov 0   ;;  %vm2379_vm4 = vcmask 408576   ;;  %vm2457_vm5 = vcmask 9216  }
  0xe0   :  { %2191 = vmatpush1.bf16.msra.mxu0 %v3201_v18  ;;  %2028 = vmatprep.subr.bf16.mxu1 %v3206_v19  ;;  %v3290_v18 = vld [vmem:[%s4435_s1 + $0x8c0] ss:$8 sps:$4 sm:$0xff]   ;;  %v3295_v19 = vld [vmem:[%s4435_s1 + $0x8d4] ss:$8 sps:$4 sm:$0xff]  }
  0xe1   :  { %2192 = vmatprep.subr.bf16.mxu0 %v3209_v20  ;;  %v3293_v20 = vld [vmem:[%s4435_s1 + $0x8d0] ss:$8 sps:$4 sm:$0xff]  }
  0xe3   :  { %2029 = vmatpush1.bf16.msra.mxu1 %v3204_v21  ;;  %v3298_v21 = vld [vmem:[%s4435_s1 + $0x8e4] ss:$8 sps:$4 sm:$0xff]  }
  0xe4   :  { %2193 = vmatpush1.bf16.msra.mxu0 %v3207_v22  ;;  %2030 = vmatprep.subr.bf16.mxu1 %v3212_v23  ;;  %v3296_v22 = vld [vmem:[%s4435_s1 + $0x8e0] ss:$8 sps:$4 sm:$0xff]   ;;  %v3301_v23 = vld [vmem:[%s4435_s1 + $0x8f4] ss:$8 sps:$4 sm:$0xff]  }
  0xe5   :  { %2194 = vmatprep.subr.bf16.mxu0 %v3215_v24  ;;  %v3299_v24 = vld [vmem:[%s4435_s1 + $0x8f0] ss:$8 sps:$4 sm:$0xff]   ;;  %s3330_s1 = smov [#allocation2]  }
  0xe7   :  { %2031 = vmatpush1.bf16.msra.mxu1 %v3210_v25  ;;  %v147_v25 = vpack.c.bf16 %v4209_v52, %v4209_v52  ;;  %v2275_v52 = vld [vmem:[%s4437_s3 + $0x78] sm:$0xff] }
  0xe8   :  { %2195 = vmatpush1.bf16.msra.mxu0 %v3213_v26  ;;  %2032 = vmatprep.subr.bf16.mxu1 %v3218_v27  ;;  %v2260_v26 = vld [vmem:[%s4437_s3] sm:$0xff]  ;;  %v2261_v27 = vld [vmem:[%s4437_s3 + $0x8] sm:$0xff] }
  0xe9   :  { %2196 = vmatprep.subr.bf16.mxu0 %v3221_v28  ;;  %v2262_v28 = vld [vmem:[%s4437_s3 + $0x10] sm:$0xff] }
  0xeb   :  { %2033 = vmatpush1.bf16.msra.mxu1 %v3216_v29  ;;  %v3327_v29 = vmov 0.0|0.0  }
  0xec   :  { %2197 = vmatpush1.bf16.msra.mxu0 %v3219_v30  ;;  %2034 = vmatprep.subr.bf16.mxu1 %v3224_v31  ;;  %v2794_v30 = vpack.c.bf16 %v2261_v27, %v2260_v26  ;;  %v2263_v31 = vld [vmem:[%s4437_s3 + $0x18] sm:$0xff]  ;;  %v2765_v26 = vld [vmem:[%s4440_s6] ss:$0 sm:$0xff] }
  0xed   :  { %2198 = vmatprep.subr.bf16.mxu0 %v3227_v32  ;;  %v2797_v32 = vpack.c.bf16 %v2263_v31, %v2262_v28 }
  0xef   :  { %2035 = vmatpush1.bf16.msra.mxu1 %v3222_v33  ;;  %v2264_v33 = vld [vmem:[%s4437_s3 + $0x20] sm:$0xff] }
  0xf0   :  { %2199 = vmatpush1.bf16.msra.mxu0 %v3225_v34  ;;  %2036 = vmatprep.subr.bf16.mxu1 %v3230_v14  ;;  %v2265_v34 = vld [vmem:[%s4437_s3 + $0x28] sm:$0xff] }
  0xf1   :  { %2200 = vmatprep.subr.bf16.mxu0 %v3233_v37  ;;  %v2800_v14 = vpack.c.bf16 %v2265_v34, %v2264_v33  ;;  %v2266_v37 = vld [vmem:[%s4437_s3 + $0x30] sm:$0xff] }
  0xf3   :  { %2037 = vmatpush1.bf16.msra.mxu1 %v3228_v38  ;;  %v2267_v38 = vld [vmem:[%s4437_s3 + $0x38] sm:$0xff] }
  0xf4   :  { %2201 = vmatpush1.bf16.msra.mxu0 %v3231_v39  ;;  %2038 = vmatprep.subr.bf16.mxu1 %v3236_v35  ;;  %v2803_v39 = vpack.c.bf16 %v2267_v38, %v2266_v37  ;;  %v2268_v35 = vld [vmem:[%s4437_s3 + $0x40] sm:$0xff] }
  0xf5   :  { %2202 = vmatprep.subr.bf16.mxu0 %v3239_v42  ;;  %v2269_v42 = vld [vmem:[%s4437_s3 + $0x48] sm:$0xff] }
  0xf7   :  { %2039 = vmatpush1.bf16.msra.mxu1 %v3234_v44  ;;  %v2806_v44 = vpack.c.bf16 %v2269_v42, %v2268_v35 }
  0xf8   :  { %2203 = vmatpush1.bf16.msra.mxu0 %v3237_v45  ;;  %2040 = vmatprep.subr.bf16.mxu1 %v3242_v49  ;;  %v2270_v45 = vld [vmem:[%s4437_s3 + $0x50] sm:$0xff]  ;;  %v2271_v49 = vld [vmem:[%s4437_s3 + $0x58] sm:$0xff] }
  0xf9   :  { %2204 = vmatprep.subr.bf16.mxu0 %v3245_v46  ;;  %v2809_v46 = vpack.c.bf16 %v2271_v49, %v2270_v45 }
  0xfb   :  { %2041 = vmatpush1.bf16.msra.mxu1 %v3240_v47  ;;  %v2272_v47 = vld [vmem:[%s4437_s3 + $0x60] sm:$0xff] }
  0xfc   :  { %2205 = vmatpush1.bf16.msra.mxu0 %v3243_v48  ;;  %2042 = vmatprep.subr.bf16.mxu1 %v3248_v50  ;;  %v2273_v48 = vld [vmem:[%s4437_s3 + $0x68] sm:$0xff] }
  0xfd   :  { %2206 = vmatprep.subr.bf16.mxu0 %v3251_v51  ;;  %v2812_v50 = vpack.c.bf16 %v2273_v48, %v2272_v47  ;;  %v2274_v51 = vld [vmem:[%s4437_s3 + $0x70] sm:$0xff] }
  0xff   :  { %2043 = vmatpush1.bf16.msra.mxu1 %v3246_v53  ;;  %v2815_v53 = vpack.c.bf16 %v2275_v52, %v2274_v51 }
 0x100   :  { %2207 = vmatpush1.bf16.msra.mxu0 %v3249_v54  ;;  %2793 = vmatprep.subr.bf16.mxu1 %v3327_v29  ;;  %v2276_v54 = vld [vmem:[%s4437_s3 + $0x80] sm:$0xff] }
 0x101   :  { %2217 = vmatprep.subr.bf16.mxu0 %v3256_v55  ;;  %v2818_v55 = vpack.c.bf16 %v2277_v15, %v2276_v54 }
 0x102   :  { %2045 = vmatmul.mubr.bf16.vlgmr.msra.gmra.mrb[0].mxu1 %v137_v40  ;;  %v2278_v40 = vld [vmem:[%s4437_s3 + $0x90] sm:$0x3f] }
 0x103   :  { %2209 = vmatmul.mubr.bf16.vlgmr.msra.gmra.mrb[0].mxu0 %v145_v56  ;;  %2795 = vmatpush1.bf16.msra.mxu1 %v2794_v30  ;;  %v3328_v56 = vmov 0.0  }
 0x104   :  { %2218 = vmatpush1.bf16.msra.mxu0 %v3254_v57  ;;  %2249 = vmatprep.mubr.bf16.mxu0 %v148_v58 }
 0x105   :  { %2219 = vmatprep.subr.bf16.mxu0 %v3259_v59  ;;  %2796 = vmatprep.subr.bf16.mxu1 %v3327_v29 }
 0x107   :  { %2798 = vmatpush1.bf16.msra.mxu1 %v2797_v32 }
 0x108   :  { %2220 = vmatpush1.bf16.msra.mxu0 %v3257_v36  ;;  %2799 = vmatprep.subr.bf16.mxu1 %v3327_v29 }
 0x109   :  { %2221 = vmatprep.subr.bf16.mxu0 %v3262_v41  ;;  %v441_v41 = vsub.s32 0, %v3488_v43 }
 0x10b   :  { %2801 = vmatpush1.bf16.msra.mxu1 %v2800_v14 }
 0x10c   :  { %2222 = vmatpush1.bf16.msra.mxu0 %v3260_v60  ;;  %2802 = vmatprep.subr.bf16.mxu1 %v3327_v29  ;;  %v437_v60 = vld [vmem:[%s4436_s2] sm:$0x3] }
 0x10d   :  { %2223 = vmatprep.subr.bf16.mxu0 %v3265_v61  ;;  %v445_v61 = vsub.s32 1, %v3488_v43 }
 0x10f   :  { %2804 = vmatpush1.bf16.msra.mxu1 %v2803_v39 }
 0x110   :  { %2224 = vmatpush1.bf16.msra.mxu0 %v3263_v62  ;;  %2805 = vmatprep.subr.bf16.mxu1 %v3327_v29  ;;  %v442_v62 = vrot.slane %v437_v60, %v441_v41 }
 0x111   :  { %2225 = vmatprep.subr.bf16.mxu0 %v3268_v63  ;;  %v446_v63 = vrot.slane %v437_v60, %v445_v61 }
 0x113   :  { %2807 = vmatpush1.bf16.msra.mxu1 %v2806_v44 }
 0x114   :  { %2226 = vmatpush1.bf16.msra.mxu0 %v3266_v0  ;;  %2808 = vmatprep.subr.bf16.mxu1 %v3327_v29 }
 0x115   :  { %2227 = vmatprep.subr.bf16.mxu0 %v3271_v1 }
 0x117   :  { %2810 = vmatpush1.bf16.msra.mxu1 %v2809_v46 }
 0x118   :  { %2228 = vmatpush1.bf16.msra.mxu0 %v3269_v2  ;;  %2811 = vmatprep.subr.bf16.mxu1 %v3327_v29 }
 0x119   :  { %2229 = vmatprep.subr.bf16.mxu0 %v3274_v3 }
 0x11b   :  { %2813 = vmatpush1.bf16.msra.mxu1 %v2812_v50 }
 0x11c   :  { %2230 = vmatpush1.bf16.msra.mxu0 %v3272_v4  ;;  %2814 = vmatprep.subr.bf16.mxu1 %v3327_v29 }
 0x11d   :  { %2231 = vmatprep.subr.bf16.mxu0 %v3277_v5  ;;  %v2365_v5 = vld [vmem:[%s4439_s5] sm:$0xff] }
 0x11f   :  { %2816 = vmatpush1.bf16.msra.mxu1 %v2815_v53 }
 0x120   :  { %2232 = vmatpush1.bf16.msra.mxu0 %v3275_v6  ;;  %2817 = vmatprep.subr.bf16.mxu1 %v3327_v29  ;;  %v2366_v6 = vld [vmem:[%s4439_s5 + $0x8] sm:$0xff] }
 0x121   :  { %2233 = vmatprep.subr.bf16.mxu0 %v3280_v7 }
 0x123   :  { %2819 = vmatpush1.bf16.msra.mxu1 %v2818_v55 }
 0x124   :  { %2234 = vmatpush1.bf16.msra.mxu0 %v3278_v8  ;;  %2330 = vmatprep.subr.mxu1 %v3328_v56 }
 0x125   :  { %2235 = vmatprep.subr.bf16.mxu0 %v3283_v9 }
 0x127   :  { %2763 = vmatpush1.msk.msra.mxu1 %vm2290_vm0, %v2278_v40 }
 0x128   :  { %2236 = vmatpush1.bf16.msra.mxu0 %v3281_v10  ;;  %2820 = vmatprep.subr.bf16.mxu1 %v3327_v29  ;;  %v2821_v10 = vpack.c.bf16 %v2366_v6, %v2365_v5 }
 0x129   :  { %2237 = vmatprep.subr.bf16.mxu0 %v3286_v11 }
 0x12c   :  { %2238 = vmatpush1.bf16.msra.mxu0 %v3284_v12  ;;  %v2367_v12 = vld [vmem:[%s4439_s5 + $0x10] sm:$0xff] }
 0x12d   :  { %2239 = vmatprep.subr.bf16.mxu0 %v3289_v13  ;;  %v2368_v13 = vld [vmem:[%s4439_s5 + $0x18] sm:$0xff] }
 0x130   :  { %2240 = vmatpush1.bf16.msra.mxu0 %v3287_v16  ;;  %v2824_v16 = vpack.c.bf16 %v2368_v13, %v2367_v12 }
 0x131   :  { %2241 = vmatprep.subr.bf16.mxu0 %v3292_v17  ;;  %v2369_v17 = vld [vmem:[%s4439_s5 + $0x20] sm:$0xff] }
 0x134   :  { %2242 = vmatpush1.bf16.msra.mxu0 %v3290_v18  ;;  %v2370_v18 = vld [vmem:[%s4439_s5 + $0x28] sm:$0xff] }
 0x135   :  { %2243 = vmatprep.subr.bf16.mxu0 %v3295_v19  ;;  %v2827_v19 = vpack.c.bf16 %v2370_v18, %v2369_v17 }
 0x138   :  { %2244 = vmatpush1.bf16.msra.mxu0 %v3293_v20  ;;  %v2371_v20 = vld [vmem:[%s4439_s5 + $0x30] sm:$0x3]  ;;  %s2465_s5 = sshll.u32 %s3330_s1, 4  ;;  %s2466_s5 = int_to_ptr.vmem [resolvable:$true] %s2465_s5 }
 0x139   :  { %2245 = vmatprep.subr.bf16.mxu0 %v3298_v21  ;;  %v2762_v21 = vld [vmem:[%s4438_s4] ss:$0 sm:$0xff]  ;;  %s3302_s15 = scalar_lea.vmem %s2466_s5, 32  ;;  %p3307_p1 = scmp.lt.s32.totalorder %s2466_s5, %s2466_s5 }
 0x13a   :  { %p3303_p0 = scmp.ne.s32.totalorder %s2466_s5, %s3302_s15  ;;  %p3308_p2 = scmp.lt.s32.totalorder %s3302_s15, %s3302_s15 }
 0x13c   :  { %2246 = vmatpush1.bf16.msra.mxu0 %v3296_v22  ;;  %p3309_p3 = por %p3308_p2, %p3307_p1 }
 0x13d   :  { %2247 = vmatprep.subr.bf16.mxu0 %v3301_v23 }
 0x13e   :  { %p3310_p4 = pnand %p3309_p3, %p3303_p0 }
 0x140   :  { %2248 = vmatpush1.bf16.msra.mxu0 %v3299_v24 }
 0x143   :  { %2250 = vmatmul.mubr.bf16.vlgmr.msra.gmra.mrb[0].mxu0 %v147_v25 }
 0x1d5   :  { %v2046_v57 = vpop.f32.mrb[0].mxu1 }
 0x1d6   :  { %v2048_v58 = vpop.f32.mrb[1].mxu1  ;;  %v2829_v0 = vadd.f32 %v2046_v57, %v442_v62 }
 0x1d7   :  { %v2050_v59 = vpop.f32.mrb[2].mxu1  ;;  %v2831_v1 = vadd.f32 %v2048_v58, %v446_v63 }
 0x1d8   :  { %v2051_v36 = vpop.f32.mrb[3].mxu1 }
 0x216   :  { %v2251_v2 = vpop.f32.mrb[0].mxu0 }
 0x217   :  { %v2830_v3 = vadd.f32 %v2829_v0, %v2251_v2  ;;  %v2253_v4 = vpop.f32.mrb[1].mxu0 }
 0x218   :  { %v2832_v7 = vadd.f32 %v2831_v1, %v2253_v4  ;;  %v2255_v8 = vpop.f32.mrb[2].mxu0 }
 0x219   :  { %v2256_v9 = vpop.f32.mrb[3].mxu0  ;;  %v2258_v11 = vmax.f32 %v2830_v3, 0.0 }
 0x21a   :  { %v2259_v43 = vmax.f32 %v2832_v7, 0.0 }
 0x21c   :  { %2764 = vmatprep.mubr.msk.f32.mxu1 %vm2286_vm1, %v2259_v43 }
 0x21d   :  { %2359 = vmatmul.mubr.f32.vlgmr.msra.gmra.mrb[4].mxu1 %v2258_v11 }
 0x21e   :  { %2822 = vmatpush3.bf16.msra.mxu1 %v2821_v10  ;;  %2790 = vmatprep.mubr.msk.f32.mxu1 %vm3329_vm3, %v3328_v56 }
 0x21f   :  { %2823 = vmatprep.subr.bf16.mxu1 %v3327_v29 }
 0x222   :  { %2825 = vmatpush3.bf16.msra.mxu1 %v2824_v16 }
 0x223   :  { %2826 = vmatprep.subr.bf16.mxu1 %v3327_v29 }
 0x226   :  { %2828 = vmatpush3.bf16.msra.mxu1 %v2827_v19 }
 0x227   :  { %2788 = vmatprep.subr.mxu1 %v3328_v56 }
 0x22a   :  { %2789 = vmatpush3.msk.msra.mxu1 %vm2383_vm2, %v2371_v20 }
 0x2f0   :  { %v2360_v22 = vpop.f32.mrb[4].mxu1 }
 0x2f1   :  { %v2361_v23 = vadd.f32 %v2762_v21, %v2360_v22  ;;  %v2362_v24 = vpop.f32.mrb[5].mxu1 }
 0x2f3   :  { %v2364_v25 = vmax.f32 %v2361_v23, 0.0 }
 0x2f5   :  { %2791 = vmatmul.mubr.msk.f32.vlgmr.msra.gmra.mrb[6].mxu1 %vm2379_vm4, %v2364_v25 }
 0x3c8   :  { %v2453_v27 = vpop.f32.mrb[6].mxu1 }
 0x3c9   :  { %v2454_v28 = vadd.f32 %v2765_v26, %v2453_v27  ;;  %v2792_v29 = vpop.f32.mrb[7].mxu1 }
 0x3cb   :  { %2458 = vst.msk [vmem:[#allocation2] sm:$0x3] %vm2457_vm5, %v2454_v28 }
 0x3cc   :  { %3313 = shalt.err (!%p3310_p4)
}
 0x3cd   :  { %s3314_s17 = scalar_lea.hbm %s4441_s7, 32 }
 0x3ce   :  { %p3315_p5 = scmp.ne.s32.totalorder %s4441_s7, %s3314_s17  ;;  %p3318_p6 = scmp.lt.u32.totalorder %s3314_s17, %s4441_s7 }
 0x3d0   :  { %p3320_p7 = pnand %p3318_p6, %p3315_p5 }
 0x3d2   :  { %3323 = shalt.err (!%p3320_p7)
}
 0x3d3   :  { %2468 = dma.vmem_to_hbm [thread:$0]  %s2466_s5, 32, %s4441_s7, [#allocation3]  }
 0x3d4   :  { %3324 = dma.done.wait [#allocation3], 32  }
 0x3d5   :  { %3325 = vsyncadd [#allocation3], 4294967264 }
 0x3d6   :  { %2472 = vsyncpa [#allocation3], 1 }

</bundles_post_ra>
